<compile_context>
chip_gen: v5e
topology: v5e:2x2
jax: 0.10.0
libtpu: 0.0.40
codegen_flags: <defaults>
</compile_context>

<pallas_src>
import functools

import jax
import jax.numpy as jnp
from jax import lax
from jax.experimental import pallas as pl
from jax.experimental.pallas import tpu as pltpu

EPS = 1e-5                      # BatchNorm2d default eps
H_GRAPH = [0, 2, 5, 9, 14]      # TopoStruc: nNode=4, len(cells)=2, non-'flat'
STEPS = 4
CONCAT = [2, 3, 4, 5]
N_EDGES = H_GRAPH[-1]           # 14


def _round_up(x, m):
    return (x + m - 1) // m * m


# ---------------------------------------------------------------------------
# Fused StemCell kernel (single grid-less call; whole cell stays in VMEM).
# ---------------------------------------------------------------------------
def _stem_cell_kernel(x0_ref, x1_ref, wpre_ref, wblk0_ref, wblk1_ref,
                      wblk2_ref, wblk3_ref, wconv_rows_ref, wskip_ref,
                      o_ref, xcat_ref, xr_ref, st_ref,
                      *, c, cb, c_pp, c_p, cppb, cpb, nb, hw):
    # x0/x1:        (N, C_prev*, HW) VMEM   (reshape-only views of NCHW)
    # wpre:         (2*CB, CPPb+CPb) VMEM   block-diag(preprocess0, preprocess1)
    # wblk{i}:      (Ji*CB, Ji*CB)   VMEM   CB-aligned block-diag edge 1x1 convs
    # wconv_rows:   (14*CB, 1)       VMEM   softmax(alpha)[:, conv] per row
    # wskip:        (14,)            SMEM   softmax(alpha)[:, skip]
    # o_ref:        (N, 4*C, HW)     VMEM   concat(states[2..5])
    # xcat_ref:     (CPPb+CPb, N*HW) VMEM scratch  relu'd folded inputs
    # xr_ref:       (5*CB, N*HW)     VMEM scratch  relu'd states 0..4
    # st_ref:       (6*CB, N*HW)     VMEM scratch  raw states 0..5
    m = nb * hw
    inv_m = 1.0 / float(m)

    # Zero channel-padding rows of xcat (stale VMEM * zero weight would NaN).
    if cppb > c_pp:
        xcat_ref[c_pp:cppb, :] = jnp.zeros((cppb - c_pp, m), jnp.float32)
    if cpb > c_p:
        xcat_ref[cppb + c_p:cppb + cpb, :] = jnp.zeros((cpb - c_p, m), jnp.float32)

    # Fold NCHW batches into lanes (relu fused into the copy).  This replaces
    # the old wrapper-side XLA transpose with lane-aligned VMEM slab copies.
    # TODO(synk): for large batch switch to pl.loop with pl.ds lane offsets.
    for b in range(nb):
        col = b * hw
        xcat_ref[0:c_pp, col:col + hw] = jnp.maximum(x0_ref[b], 0.0)
        xcat_ref[cppb:cppb + c_p, col:col + hw] = jnp.maximum(x1_ref[b], 0.0)

    def bn_rows(y):
        # Per-channel-row batch stats over all N*H*W columns (training-mode BN,
        # biased variance, affine=False).  One-pass stats, variance clamped.
        ysum = jnp.sum(y, axis=1, keepdims=True)
        ysq = jnp.sum(y * y, axis=1, keepdims=True)
        mean = ysum * inv_m
        var = jnp.maximum(ysq * inv_m - mean * mean, 0.0)
        return mean, lax.rsqrt(var + EPS)

    # --- preprocess0 + preprocess1 as ONE block-diagonal matmul + BN pass ---
    ypre = jnp.dot(wpre_ref[...], xcat_ref[...],
                   preferred_element_type=jnp.float32)          # (2*CB, M)
    mean, rstd = bn_rows(ypre)
    s01 = (ypre - mean) * rstd
    st_ref[0:2 * cb, :] = s01                                   # raw states 0,1
    xr_ref[0:2 * cb, :] = jnp.maximum(s01, 0.0)                 # relu'd

    wblks = (wblk0_ref, wblk1_ref, wblk2_ref, wblk3_ref)
    for i in range(STEPS):                                      # static unroll
        nj = i + 2                                              # inputs of node
        off = H_GRAPH[i]

        # All nj per-edge 1x1 convs of this node as one block-diag matmul.
        # TODO(synk): at production C >= 64 switch to per-edge matmuls (the
        # block-diag zero-pads the MXU contraction dim by nj x).
        xall = xr_ref[0:nj * cb, :]                             # (nj*CB, M)
        yall = jnp.dot(wblks[i][...], xall,
                       preferred_element_type=jnp.float32)      # (nj*CB, M)
        mean, rstd = bn_rows(yall)
        # Mixed-op conv weight folded into the BN scale; whole-slab normalize
        # hoisted out of the per-edge loop.
        scale = rstd * wconv_rows_ref[off * cb:(off + nj) * cb, :]
        ynorm = (yall - mean) * scale                           # (nj*CB, M)

        acc = jnp.zeros((cb, m), jnp.float32)
        for j in range(nj):                                     # aligned slices
            r0 = j * cb
            acc = acc + wskip_ref[off + j] * st_ref[r0:r0 + cb, :] \
                      + ynorm[r0:r0 + cb, :]

        st_ref[nj * cb:(nj + 1) * cb, :] = acc                  # state i+2
        if i < STEPS - 1:                                       # state 5 never re-used
            xr_ref[nj * cb:(nj + 1) * cb, :] = jnp.maximum(acc, 0.0)

    # --- unfold (C, N*HW) node states back into the (N, 4C, HW) output ---
    # (sublane-aligned when C % 8 == 0; at toy C=4 these 4*N stores are masked.)
    for b in range(nb):
        col = b * hw
        for i in range(STEPS):
            r0 = (i + 2) * cb
            o_ref[b, i * c:(i + 1) * c, :] = st_ref[r0:r0 + c, col:col + hw]


# ---------------------------------------------------------------------------
# StemCell forward wrapper (no transposes around the call -- reshapes only)
# ---------------------------------------------------------------------------
@jax.jit
def stem_cell_forward(s_prev_prev, s_prev, params):
    nb, c_pp, h, w = s_prev_prev.shape
    _, c_p, _, _ = s_prev.shape
    c = params["pre0_w"].shape[0]
    hw = h * w
    m = nb * hw
    cb = _round_up(max(c, 8), 8)            # 8-sublane-aligned channel block
    cppb = _round_up(c_pp, 8)
    cpb = _round_up(c_p, 8)

    # alpha.get_weight('forward'): softmax over primitives per edge.
    weights = jax.nn.softmax(params["alpha"], axis=-1)          # (14, 3)
    w_skip = weights[:, 1].astype(jnp.float32)                  # (14,)
    w_conv = weights[:, 2].astype(jnp.float32)                  # (14,)
    # Per-row mixed conv weights: one CB-row block per edge (pad rows unused).
    wconv_rows = jnp.repeat(w_conv, cb)[:, None]                # (14*CB, 1)

    # Merged preprocess weight: block_diag(pre0_w, pre1_w), CB-aligned blocks.
    wpre = jnp.zeros((2 * cb, cppb + cpb), jnp.float32)
    wpre = wpre.at[0:c, 0:c_pp].set(params["pre0_w"])
    wpre = wpre.at[cb:cb + c, cppb:cppb + c_p].set(params["pre1_w"])

    # Per-node block-diagonal edge-conv weights with CB-aligned blocks.
    ecw = params["edge_conv_w"]                                 # (14, C, C)
    wblks = []
    for i in range(STEPS):
        lo, hi = H_GRAPH[i], H_GRAPH[i + 1]
        nj = hi - lo
        wb = jnp.zeros((nj * cb, nj * cb), jnp.float32)
        for j in range(nj):
            wb = wb.at[j * cb:j * cb + c, j * cb:j * cb + c].set(ecw[lo + j])
        wblks.append(wb)

    # NCHW -> (N, C, HW) is a pure reshape: no XLA transpose, no extra HBM pass.
    x0 = s_prev_prev.reshape(nb, c_pp, hw).astype(jnp.float32)
    x1 = s_prev.reshape(nb, c_p, hw).astype(jnp.float32)

    # Working-set sizing + scheduler hints.
    weight_elems = wpre.size + sum(wb.size for wb in wblks) + wconv_rows.size
    io_elems = x0.size + x1.size + nb * len(CONCAT) * c * hw
    scratch_elems = (cppb + cpb) * m + 5 * cb * m + 6 * cb * m
    need_bytes = 4 * (io_elems + weight_elems + scratch_elems)
    vmem_limit = int(min(64 * 2 ** 20, max(16 * 2 ** 20, 2 * need_bytes)))

    mm_flops = 2 * m * (2 * cb) * (cppb + cpb) \
        + sum(2 * m * ((i + 2) * cb) ** 2 for i in range(STEPS))
    ew_flops = 24 * 6 * cb * m
    cost = pl.CostEstimate(flops=int(mm_flops + ew_flops),
                           transcendentals=int(16 * cb),
                           bytes_accessed=int(4 * (io_elems + weight_elems)))

    kernel = functools.partial(
        _stem_cell_kernel, c=c, cb=cb, c_pp=c_pp, c_p=c_p,
        cppb=cppb, cpb=cpb, nb=nb, hw=hw)

    out = pl.pallas_call(
        kernel,
        out_shape=jax.ShapeDtypeStruct((nb, len(CONCAT) * c, hw), jnp.float32),
        in_specs=[pl.BlockSpec(memory_space=pltpu.MemorySpace.VMEM)] * 8
                 + [pl.BlockSpec(memory_space=pltpu.MemorySpace.SMEM)],
        out_specs=pl.BlockSpec(memory_space=pltpu.MemorySpace.VMEM),
        scratch_shapes=[
            pltpu.VMEM((cppb + cpb, m), jnp.float32),   # relu'd folded inputs
            pltpu.VMEM((5 * cb, m), jnp.float32),       # relu'd states 0..4
            pltpu.VMEM((6 * cb, m), jnp.float32),       # raw states 0..5
        ],
        compiler_params=pltpu.CompilerParams(vmem_limit_bytes=vmem_limit),
        cost_estimate=cost,
    )(x0, x1, wpre, wblks[0], wblks[1], wblks[2], wblks[3], wconv_rows, w_skip)

    # (N, 4C, HW) -> NCHW is again a pure reshape.
    return out.reshape(nb, len(CONCAT) * c, h, w)


# ---------------------------------------------------------------------------
# Pure-JAX reference (same semantics, naive per-edge form) for validation
# ---------------------------------------------------------------------------
def _nchw_to_cm(x):
    n, c, h, w = x.shape
    return jnp.transpose(x, (1, 0, 2, 3)).reshape(c, n * h * w)


def _cm_to_nchw(x, n, h, w):
    c = x.shape[0]
    return jnp.transpose(x.reshape(c, n, h, w), (1, 0, 2, 3))


def _stem_cell_reference(s_prev_prev, s_prev, params):
    weights = jax.nn.softmax(params["alpha"], axis=-1)

    def rcbn(x_cm, wmat):
        xr = jnp.maximum(x_cm, 0.0)
        y = jnp.dot(wmat, xr, precision=lax.Precision.HIGHEST)
        mean = jnp.mean(y, axis=1, keepdims=True)
        var = jnp.mean((y - mean) ** 2, axis=1, keepdims=True)
        return (y - mean) / jnp.sqrt(var + EPS)

    n, _, h, w = s_prev.shape
    x0 = _nchw_to_cm(s_prev_prev)
    x1 = _nchw_to_cm(s_prev)
    s0 = rcbn(x0, params["pre0_w"])
    s1 = rcbn(x1, params["pre1_w"])
    states = [s0, s1]
    for i in range(STEPS):
        off = H_GRAPH[i]
        s = jnp.zeros_like(s0)
        for j, hstate in enumerate(states):
            wj = weights[off + j]
            s = s + wj[1] * hstate \
                  + wj[2] * rcbn(hstate, params["edge_conv_w"][off + j])
        states.append(s)
    out = jnp.concatenate([states[k] for k in CONCAT], axis=0)
    return _cm_to_nchw(out, n, h, w)


# ---------------------------------------------------------------------------
if __name__ == "__main__":
    N, C, H, W = 2, 4, 16, 16
    C_PREV_PREV = C_PREV = len(CONCAT) * C      # previous cells' nChanel = 16
    N_PRIMS = 3                                 # none, skip, relu_conv_bn_1x1

    key = jax.random.PRNGKey(0)
    k1, k2, k3, k4, k5, k6 = jax.random.split(key, 6)

    s_prev_prev = jax.random.normal(k1, (N, C_PREV_PREV, H, W), jnp.float32)
    s_prev = jax.random.normal(k2, (N, C_PREV, H, W), jnp.float32)

    # Conv2d 1x1 weights stored as (C_out, C_in).
    params = {
        "pre0_w": 0.1 * jax.random.normal(k3, (C, C_PREV_PREV), jnp.float32),
        "pre1_w": 0.1 * jax.random.normal(k4, (C, C_PREV), jnp.float32),
        "edge_conv_w": 0.1 * jax.random.normal(k5, (N_EDGES, C, C), jnp.float32),
        "alpha": 1e-3 * jax.random.normal(k6, (N_EDGES, N_PRIMS), jnp.float32),
    }

    out = stem_cell_forward(s_prev_prev, s_prev, params)
    out = jax.block_until_ready(out)
    assert out.shape == (N, len(CONCAT) * C, H, W), out.shape
    assert bool(jnp.all(jnp.isfinite(out)))

    ref = _stem_cell_reference(s_prev_prev, s_prev, params)
    max_err = float(jnp.max(jnp.abs(out - ref)))
    assert jnp.allclose(out, ref, rtol=5e-2, atol=5e-2), max_err

    print("KERNEL_OK")
</pallas_src>

<mosaic_0001>
module attributes {stable_mosaic.version = 11 : i64} {
  func.func @_stem_cell_kernel(%arg0: memref<2x16x256xf32, #tpu.memory_space<vmem>>, %arg1: memref<2x16x256xf32, #tpu.memory_space<vmem>>, %arg2: memref<16x32xf32, #tpu.memory_space<vmem>>, %arg3: memref<16x16xf32, #tpu.memory_space<vmem>>, %arg4: memref<24x24xf32, #tpu.memory_space<vmem>>, %arg5: memref<32x32xf32, #tpu.memory_space<vmem>>, %arg6: memref<40x40xf32, #tpu.memory_space<vmem>>, %arg7: memref<112x1xf32, #tpu.memory_space<vmem>>, %arg8: memref<14xf32, #tpu.memory_space<smem>>, %arg9: memref<2x16x256xf32, #tpu.memory_space<vmem>>, %arg10: memref<32x512xf32, #tpu.memory_space<vmem>>, %arg11: memref<40x512xf32, #tpu.memory_space<vmem>>, %arg12: memref<48x512xf32, #tpu.memory_space<vmem>>) attributes {dimension_semantics = [], scalar_prefetch = 0 : i64, scratch_operands = 3 : i64, tpu.core_type = #tpu.core_type<tc>} {
    %c0 = arith.constant 0 : index
    %c0_0 = arith.constant 0 : index
    %c0_1 = arith.constant 0 : index
    %0 = vector.load %arg0[%c0, %c0_0, %c0_1] : memref<2x16x256xf32, #tpu.memory_space<vmem>>, vector<1x16x256xf32>
    %1 = vector.shape_cast %0 : vector<1x16x256xf32> to vector<16x256xf32>
    %cst = arith.constant 0.000000e+00 : f32
    %2 = vector.broadcast %cst : f32 to vector<16x256xf32>
    %3 = arith.maximumf %1, %2 : vector<16x256xf32>
    %c0_2 = arith.constant 0 : index
    %c0_3 = arith.constant 0 : index
    %4 = vector.load %arg10[%c0_2, %c0_3] : memref<32x512xf32, #tpu.memory_space<vmem>>, vector<16x256xf32>
    tpu.vector_store %arg10[%c0_2, %c0_3], %3 {strides = array<i32>} : memref<32x512xf32, #tpu.memory_space<vmem>>, vector<16x256xf32>,
    %c0_4 = arith.constant 0 : index
    %c0_5 = arith.constant 0 : index
    %c0_6 = arith.constant 0 : index
    %5 = vector.load %arg1[%c0_4, %c0_5, %c0_6] : memref<2x16x256xf32, #tpu.memory_space<vmem>>, vector<1x16x256xf32>
    %6 = vector.shape_cast %5 : vector<1x16x256xf32> to vector<16x256xf32>
    %cst_7 = arith.constant 0.000000e+00 : f32
    %7 = vector.broadcast %cst_7 : f32 to vector<16x256xf32>
    %8 = arith.maximumf %6, %7 : vector<16x256xf32>
    %c16 = arith.constant 16 : index
    %c0_8 = arith.constant 0 : index
    %9 = vector.load %arg10[%c16, %c0_8] : memref<32x512xf32, #tpu.memory_space<vmem>>, vector<16x256xf32>
    tpu.vector_store %arg10[%c16, %c0_8], %8 {strides = array<i32>} : memref<32x512xf32, #tpu.memory_space<vmem>>, vector<16x256xf32>,
    %c1 = arith.constant 1 : index
    %c0_9 = arith.constant 0 : index
    %c0_10 = arith.constant 0 : index
    %10 = vector.load %arg0[%c1, %c0_9, %c0_10] : memref<2x16x256xf32, #tpu.memory_space<vmem>>, vector<1x16x256xf32>
    %11 = vector.shape_cast %10 : vector<1x16x256xf32> to vector<16x256xf32>
    %cst_11 = arith.constant 0.000000e+00 : f32
    %12 = vector.broadcast %cst_11 : f32 to vector<16x256xf32>
    %13 = arith.maximumf %11, %12 : vector<16x256xf32>
    %c0_12 = arith.constant 0 : index
    %c256 = arith.constant 256 : index
    %14 = vector.load %arg10[%c0_12, %c256] : memref<32x512xf32, #tpu.memory_space<vmem>>, vector<16x256xf32>
    tpu.vector_store %arg10[%c0_12, %c256], %13 {strides = array<i32>} : memref<32x512xf32, #tpu.memory_space<vmem>>, vector<16x256xf32>,
    %c1_13 = arith.constant 1 : index
    %c0_14 = arith.constant 0 : index
    %c0_15 = arith.constant 0 : index
    %15 = vector.load %arg1[%c1_13, %c0_14, %c0_15] : memref<2x16x256xf32, #tpu.memory_space<vmem>>, vector<1x16x256xf32>
    %16 = vector.shape_cast %15 : vector<1x16x256xf32> to vector<16x256xf32>
    %cst_16 = arith.constant 0.000000e+00 : f32
    %17 = vector.broadcast %cst_16 : f32 to vector<16x256xf32>
    %18 = arith.maximumf %16, %17 : vector<16x256xf32>
    %c16_17 = arith.constant 16 : index
    %c256_18 = arith.constant 256 : index
    %19 = vector.load %arg10[%c16_17, %c256_18] : memref<32x512xf32, #tpu.memory_space<vmem>>, vector<16x256xf32>
    tpu.vector_store %arg10[%c16_17, %c256_18], %18 {strides = array<i32>} : memref<32x512xf32, #tpu.memory_space<vmem>>, vector<16x256xf32>,
    %c0_19 = arith.constant 0 : index
    %c0_20 = arith.constant 0 : index
    %20 = vector.load %arg2[%c0_19, %c0_20] : memref<16x32xf32, #tpu.memory_space<vmem>>, vector<16x32xf32>
    %c0_21 = arith.constant 0 : index
    %c0_22 = arith.constant 0 : index
    %21 = vector.load %arg10[%c0_21, %c0_22] : memref<32x512xf32, #tpu.memory_space<vmem>>, vector<32x512xf32>
    %cst_23 = arith.constant dense<0.000000e+00> : vector<16x512xf32>
    %22 = tpu.matmul %20, %21, %cst_23 {dimension_numbers = #tpu.dot_dimension_numbers<[1], [0], [0], [1], [0, 0, 1, 1], [], []>} : vector<16x32xf32>, vector<32x512xf32>, vector<16x512xf32> -> vector<16x512xf32>
    %cst_24 = arith.constant dense<0.000000e+00> : vector<16xf32>
    %23 = vector.multi_reduction <add>, %22, %cst_24 [1] : vector<16x512xf32> to vector<16xf32>
    %24 = vector.shape_cast %23 : vector<16xf32> to vector<16x1xf32>
    %25 = arith.mulf %22, %22 : vector<16x512xf32>
    %cst_25 = arith.constant dense<0.000000e+00> : vector<16xf32>
    %26 = vector.multi_reduction <add>, %25, %cst_25 [1] : vector<16x512xf32> to vector<16xf32>
    %27 = vector.shape_cast %26 : vector<16xf32> to vector<16x1xf32>
    %cst_26 = arith.constant 0.001953125 : f32
    %28 = vector.broadcast %cst_26 : f32 to vector<16x1xf32>
    %29 = arith.mulf %24, %28 : vector<16x1xf32>
    %cst_27 = arith.constant 0.001953125 : f32
    %30 = vector.broadcast %cst_27 : f32 to vector<16x1xf32>
    %31 = arith.mulf %27, %30 : vector<16x1xf32>
    %32 = arith.mulf %29, %29 : vector<16x1xf32>
    %33 = arith.subf %31, %32 : vector<16x1xf32>
    %cst_28 = arith.constant 0.000000e+00 : f32
    %34 = vector.broadcast %cst_28 : f32 to vector<16x1xf32>
    %35 = arith.maximumf %33, %34 : vector<16x1xf32>
    %cst_29 = arith.constant 9.99999974E-6 : f32
    %36 = vector.broadcast %cst_29 : f32 to vector<16x1xf32>
    %37 = arith.addf %35, %36 : vector<16x1xf32>
    %38 = math.rsqrt %37 : vector<16x1xf32>
    %39 = vector.broadcast %29 : vector<16x1xf32> to vector<16x512xf32>
    %40 = arith.subf %22, %39 : vector<16x512xf32>
    %41 = vector.broadcast %38 : vector<16x1xf32> to vector<16x512xf32>
    %42 = arith.mulf %40, %41 : vector<16x512xf32>
    %c0_30 = arith.constant 0 : index
    %c0_31 = arith.constant 0 : index
    %43 = vector.load %arg12[%c0_30, %c0_31] : memref<48x512xf32, #tpu.memory_space<vmem>>, vector<16x512xf32>
    tpu.vector_store %arg12[%c0_30, %c0_31], %42 {strides = array<i32>} : memref<48x512xf32, #tpu.memory_space<vmem>>, vector<16x512xf32>,
    %cst_32 = arith.constant 0.000000e+00 : f32
    %44 = vector.broadcast %cst_32 : f32 to vector<16x512xf32>
    %45 = arith.maximumf %42, %44 : vector<16x512xf32>
    %c0_33 = arith.constant 0 : index
    %c0_34 = arith.constant 0 : index
    %46 = vector.load %arg11[%c0_33, %c0_34] : memref<40x512xf32, #tpu.memory_space<vmem>>, vector<16x512xf32>
    tpu.vector_store %arg11[%c0_33, %c0_34], %45 {strides = array<i32>} : memref<40x512xf32, #tpu.memory_space<vmem>>, vector<16x512xf32>,
    %c0_35 = arith.constant 0 : index
    %c0_36 = arith.constant 0 : index
    %47 = vector.load %arg11[%c0_35, %c0_36] : memref<40x512xf32, #tpu.memory_space<vmem>>, vector<16x512xf32>
    %c0_37 = arith.constant 0 : index
    %c0_38 = arith.constant 0 : index
    %48 = vector.load %arg3[%c0_37, %c0_38] : memref<16x16xf32, #tpu.memory_space<vmem>>, vector<16x16xf32>
    %cst_39 = arith.constant dense<0.000000e+00> : vector<16x512xf32>
    %49 = tpu.matmul %48, %47, %cst_39 {dimension_numbers = #tpu.dot_dimension_numbers<[1], [0], [0], [1], [0, 0, 1, 1], [], []>} : vector<16x16xf32>, vector<16x512xf32>, vector<16x512xf32> -> vector<16x512xf32>
    %cst_40 = arith.constant dense<0.000000e+00> : vector<16xf32>
    %50 = vector.multi_reduction <add>, %49, %cst_40 [1] : vector<16x512xf32> to vector<16xf32>
    %51 = vector.shape_cast %50 : vector<16xf32> to vector<16x1xf32>
    %52 = arith.mulf %49, %49 : vector<16x512xf32>
    %cst_41 = arith.constant dense<0.000000e+00> : vector<16xf32>
    %53 = vector.multi_reduction <add>, %52, %cst_41 [1] : vector<16x512xf32> to vector<16xf32>
    %54 = vector.shape_cast %53 : vector<16xf32> to vector<16x1xf32>
    %cst_42 = arith.constant 0.001953125 : f32
    %55 = vector.broadcast %cst_42 : f32 to vector<16x1xf32>
    %56 = arith.mulf %51, %55 : vector<16x1xf32>
    %cst_43 = arith.constant 0.001953125 : f32
    %57 = vector.broadcast %cst_43 : f32 to vector<16x1xf32>
    %58 = arith.mulf %54, %57 : vector<16x1xf32>
    %59 = arith.mulf %56, %56 : vector<16x1xf32>
    %60 = arith.subf %58, %59 : vector<16x1xf32>
    %cst_44 = arith.constant 0.000000e+00 : f32
    %61 = vector.broadcast %cst_44 : f32 to vector<16x1xf32>
    %62 = arith.maximumf %60, %61 : vector<16x1xf32>
    %cst_45 = arith.constant 9.99999974E-6 : f32
    %63 = vector.broadcast %cst_45 : f32 to vector<16x1xf32>
    %64 = arith.addf %62, %63 : vector<16x1xf32>
    %65 = math.rsqrt %64 : vector<16x1xf32>
    %c0_46 = arith.constant 0 : index
    %c0_47 = arith.constant 0 : index
    %66 = vector.load %arg7[%c0_46, %c0_47] : memref<112x1xf32, #tpu.memory_space<vmem>>, vector<16x1xf32>
    %67 = arith.mulf %65, %66 : vector<16x1xf32>
    %68 = vector.broadcast %56 : vector<16x1xf32> to vector<16x512xf32>
    %69 = arith.subf %49, %68 : vector<16x512xf32>
    %70 = vector.broadcast %67 : vector<16x1xf32> to vector<16x512xf32>
    %71 = arith.mulf %69, %70 : vector<16x512xf32>
    %cst_48 = arith.constant 0.000000e+00 : f32
    %72 = vector.broadcast %cst_48 : f32 to vector<8x512xf32>
    %c0_49 = arith.constant 0 : index
    %73 = memref.load %arg8[%c0_49] : memref<14xf32, #tpu.memory_space<smem>>
    %c0_50 = arith.constant 0 : index
    %c0_51 = arith.constant 0 : index
    %74 = vector.load %arg12[%c0_50, %c0_51] : memref<48x512xf32, #tpu.memory_space<vmem>>, vector<8x512xf32>
    %75 = vector.broadcast %73 : f32 to vector<8x512xf32>
    %76 = arith.mulf %75, %74 : vector<8x512xf32>
    %77 = arith.addf %72, %76 : vector<8x512xf32>
    %78 = vector.extract_strided_slice %71 {offsets = [0, 0], sizes = [8, 512], strides = [1, 1]} : vector<16x512xf32> to vector<8x512xf32>
    %79 = arith.addf %77, %78 : vector<8x512xf32>
    %c1_52 = arith.constant 1 : index
    %80 = memref.load %arg8[%c1_52] : memref<14xf32, #tpu.memory_space<smem>>
    %c8 = arith.constant 8 : index
    %c0_53 = arith.constant 0 : index
    %81 = vector.load %arg12[%c8, %c0_53] : memref<48x512xf32, #tpu.memory_space<vmem>>, vector<8x512xf32>
    %82 = vector.broadcast %80 : f32 to vector<8x512xf32>
    %83 = arith.mulf %82, %81 : vector<8x512xf32>
    %84 = arith.addf %79, %83 : vector<8x512xf32>
    %85 = vector.extract_strided_slice %71 {offsets = [8, 0], sizes = [8, 512], strides = [1, 1]} : vector<16x512xf32> to vector<8x512xf32>
    %86 = arith.addf %84, %85 : vector<8x512xf32>
    %c16_54 = arith.constant 16 : index
    %c0_55 = arith.constant 0 : index
    %87 = vector.load %arg12[%c16_54, %c0_55] : memref<48x512xf32, #tpu.memory_space<vmem>>, vector<8x512xf32>
    tpu.vector_store %arg12[%c16_54, %c0_55], %86 {strides = array<i32>} : memref<48x512xf32, #tpu.memory_space<vmem>>, vector<8x512xf32>,
    %cst_56 = arith.constant 0.000000e+00 : f32
    %88 = vector.broadcast %cst_56 : f32 to vector<8x512xf32>
    %89 = arith.maximumf %86, %88 : vector<8x512xf32>
    %c16_57 = arith.constant 16 : index
    %c0_58 = arith.constant 0 : index
    %90 = vector.load %arg11[%c16_57, %c0_58] : memref<40x512xf32, #tpu.memory_space<vmem>>, vector<8x512xf32>
    tpu.vector_store %arg11[%c16_57, %c0_58], %89 {strides = array<i32>} : memref<40x512xf32, #tpu.memory_space<vmem>>, vector<8x512xf32>,
    %c0_59 = arith.constant 0 : index
    %c0_60 = arith.constant 0 : index
    %91 = vector.load %arg11[%c0_59, %c0_60] : memref<40x512xf32, #tpu.memory_space<vmem>>, vector<24x512xf32>
    %c0_61 = arith.constant 0 : index
    %c0_62 = arith.constant 0 : index
    %92 = vector.load %arg4[%c0_61, %c0_62] : memref<24x24xf32, #tpu.memory_space<vmem>>, vector<24x24xf32>
    %cst_63 = arith.constant dense<0.000000e+00> : vector<24x512xf32>
    %93 = tpu.matmul %92, %91, %cst_63 {dimension_numbers = #tpu.dot_dimension_numbers<[1], [0], [0], [1], [0, 0, 1, 1], [], []>} : vector<24x24xf32>, vector<24x512xf32>, vector<24x512xf32> -> vector<24x512xf32>
    %cst_64 = arith.constant dense<0.000000e+00> : vector<24xf32>
    %94 = vector.multi_reduction <add>, %93, %cst_64 [1] : vector<24x512xf32> to vector<24xf32>
    %95 = vector.shape_cast %94 : vector<24xf32> to vector<24x1xf32>
    %96 = arith.mulf %93, %93 : vector<24x512xf32>
    %cst_65 = arith.constant dense<0.000000e+00> : vector<24xf32>
    %97 = vector.multi_reduction <add>, %96, %cst_65 [1] : vector<24x512xf32> to vector<24xf32>
    %98 = vector.shape_cast %97 : vector<24xf32> to vector<24x1xf32>
    %cst_66 = arith.constant 0.001953125 : f32
    %99 = vector.broadcast %cst_66 : f32 to vector<24x1xf32>
    %100 = arith.mulf %95, %99 : vector<24x1xf32>
    %cst_67 = arith.constant 0.001953125 : f32
    %101 = vector.broadcast %cst_67 : f32 to vector<24x1xf32>
    %102 = arith.mulf %98, %101 : vector<24x1xf32>
    %103 = arith.mulf %100, %100 : vector<24x1xf32>
    %104 = arith.subf %102, %103 : vector<24x1xf32>
    %cst_68 = arith.constant 0.000000e+00 : f32
    %105 = vector.broadcast %cst_68 : f32 to vector<24x1xf32>
    %106 = arith.maximumf %104, %105 : vector<24x1xf32>
    %cst_69 = arith.constant 9.99999974E-6 : f32
    %107 = vector.broadcast %cst_69 : f32 to vector<24x1xf32>
    %108 = arith.addf %106, %107 : vector<24x1xf32>
    %109 = math.rsqrt %108 : vector<24x1xf32>
    %c16_70 = arith.constant 16 : index
    %c0_71 = arith.constant 0 : index
    %110 = vector.load %arg7[%c16_70, %c0_71] : memref<112x1xf32, #tpu.memory_space<vmem>>, vector<24x1xf32>
    %111 = arith.mulf %109, %110 : vector<24x1xf32>
    %112 = vector.broadcast %100 : vector<24x1xf32> to vector<24x512xf32>
    %113 = arith.subf %93, %112 : vector<24x512xf32>
    %114 = vector.broadcast %111 : vector<24x1xf32> to vector<24x512xf32>
    %115 = arith.mulf %113, %114 : vector<24x512xf32>
    %cst_72 = arith.constant 0.000000e+00 : f32
    %116 = vector.broadcast %cst_72 : f32 to vector<8x512xf32>
    %c2 = arith.constant 2 : index
    %117 = memref.load %arg8[%c2] : memref<14xf32, #tpu.memory_space<smem>>
    %c0_73 = arith.constant 0 : index
    %c0_74 = arith.constant 0 : index
    %118 = vector.load %arg12[%c0_73, %c0_74] : memref<48x512xf32, #tpu.memory_space<vmem>>, vector<8x512xf32>
    %119 = vector.broadcast %117 : f32 to vector<8x512xf32>
    %120 = arith.mulf %119, %118 : vector<8x512xf32>
    %121 = arith.addf %116, %120 : vector<8x512xf32>
    %122 = vector.extract_strided_slice %115 {offsets = [0, 0], sizes = [8, 512], strides = [1, 1]} : vector<24x512xf32> to vector<8x512xf32>
    %123 = arith.addf %121, %122 : vector<8x512xf32>
    %c3 = arith.constant 3 : index
    %124 = memref.load %arg8[%c3] : memref<14xf32, #tpu.memory_space<smem>>
    %c8_75 = arith.constant 8 : index
    %c0_76 = arith.constant 0 : index
    %125 = vector.load %arg12[%c8_75, %c0_76] : memref<48x512xf32, #tpu.memory_space<vmem>>, vector<8x512xf32>
    %126 = vector.broadcast %124 : f32 to vector<8x512xf32>
    %127 = arith.mulf %126, %125 : vector<8x512xf32>
    %128 = arith.addf %123, %127 : vector<8x512xf32>
    %129 = vector.extract_strided_slice %115 {offsets = [8, 0], sizes = [8, 512], strides = [1, 1]} : vector<24x512xf32> to vector<8x512xf32>
    %130 = arith.addf %128, %129 : vector<8x512xf32>
    %c4 = arith.constant 4 : index
    %131 = memref.load %arg8[%c4] : memref<14xf32, #tpu.memory_space<smem>>
    %c16_77 = arith.constant 16 : index
    %c0_78 = arith.constant 0 : index
    %132 = vector.load %arg12[%c16_77, %c0_78] : memref<48x512xf32, #tpu.memory_space<vmem>>, vector<8x512xf32>
    %133 = vector.broadcast %131 : f32 to vector<8x512xf32>
    %134 = arith.mulf %133, %132 : vector<8x512xf32>
    %135 = arith.addf %130, %134 : vector<8x512xf32>
    %136 = vector.extract_strided_slice %115 {offsets = [16, 0], sizes = [8, 512], strides = [1, 1]} : vector<24x512xf32> to vector<8x512xf32>
    %137 = arith.addf %135, %136 : vector<8x512xf32>
    %c24 = arith.constant 24 : index
    %c0_79 = arith.constant 0 : index
    %138 = vector.load %arg12[%c24, %c0_79] : memref<48x512xf32, #tpu.memory_space<vmem>>, vector<8x512xf32>
    tpu.vector_store %arg12[%c24, %c0_79], %137 {strides = array<i32>} : memref<48x512xf32, #tpu.memory_space<vmem>>, vector<8x512xf32>,
    %cst_80 = arith.constant 0.000000e+00 : f32
    %139 = vector.broadcast %cst_80 : f32 to vector<8x512xf32>
    %140 = arith.maximumf %137, %139 : vector<8x512xf32>
    %c24_81 = arith.constant 24 : index
    %c0_82 = arith.constant 0 : index
    %141 = vector.load %arg11[%c24_81, %c0_82] : memref<40x512xf32, #tpu.memory_space<vmem>>, vector<8x512xf32>
    tpu.vector_store %arg11[%c24_81, %c0_82], %140 {strides = array<i32>} : memref<40x512xf32, #tpu.memory_space<vmem>>, vector<8x512xf32>,
    %c0_83 = arith.constant 0 : index
    %c0_84 = arith.constant 0 : index
    %142 = vector.load %arg11[%c0_83, %c0_84] : memref<40x512xf32, #tpu.memory_space<vmem>>, vector<32x512xf32>
    %c0_85 = arith.constant 0 : index
    %c0_86 = arith.constant 0 : index
    %143 = vector.load %arg5[%c0_85, %c0_86] : memref<32x32xf32, #tpu.memory_space<vmem>>, vector<32x32xf32>
    %cst_87 = arith.constant dense<0.000000e+00> : vector<32x512xf32>
    %144 = tpu.matmul %143, %142, %cst_87 {dimension_numbers = #tpu.dot_dimension_numbers<[1], [0], [0], [1], [0, 0, 1, 1], [], []>} : vector<32x32xf32>, vector<32x512xf32>, vector<32x512xf32> -> vector<32x512xf32>
    %cst_88 = arith.constant dense<0.000000e+00> : vector<32xf32>
    %145 = vector.multi_reduction <add>, %144, %cst_88 [1] : vector<32x512xf32> to vector<32xf32>
    %146 = vector.shape_cast %145 : vector<32xf32> to vector<32x1xf32>
    %147 = arith.mulf %144, %144 : vector<32x512xf32>
    %cst_89 = arith.constant dense<0.000000e+00> : vector<32xf32>
    %148 = vector.multi_reduction <add>, %147, %cst_89 [1] : vector<32x512xf32> to vector<32xf32>
    %149 = vector.shape_cast %148 : vector<32xf32> to vector<32x1xf32>
    %cst_90 = arith.constant 0.001953125 : f32
    %150 = vector.broadcast %cst_90 : f32 to vector<32x1xf32>
    %151 = arith.mulf %146, %150 : vector<32x1xf32>
    %cst_91 = arith.constant 0.001953125 : f32
    %152 = vector.broadcast %cst_91 : f32 to vector<32x1xf32>
    %153 = arith.mulf %149, %152 : vector<32x1xf32>
    %154 = arith.mulf %151, %151 : vector<32x1xf32>
    %155 = arith.subf %153, %154 : vector<32x1xf32>
    %cst_92 = arith.constant 0.000000e+00 : f32
    %156 = vector.broadcast %cst_92 : f32 to vector<32x1xf32>
    %157 = arith.maximumf %155, %156 : vector<32x1xf32>
    %cst_93 = arith.constant 9.99999974E-6 : f32
    %158 = vector.broadcast %cst_93 : f32 to vector<32x1xf32>
    %159 = arith.addf %157, %158 : vector<32x1xf32>
    %160 = math.rsqrt %159 : vector<32x1xf32>
    %c40 = arith.constant 40 : index
    %c0_94 = arith.constant 0 : index
    %161 = vector.load %arg7[%c40, %c0_94] : memref<112x1xf32, #tpu.memory_space<vmem>>, vector<32x1xf32>
    %162 = arith.mulf %160, %161 : vector<32x1xf32>
    %163 = vector.broadcast %151 : vector<32x1xf32> to vector<32x512xf32>
    %164 = arith.subf %144, %163 : vector<32x512xf32>
    %165 = vector.broadcast %162 : vector<32x1xf32> to vector<32x512xf32>
    %166 = arith.mulf %164, %165 : vector<32x512xf32>
    %cst_95 = arith.constant 0.000000e+00 : f32
    %167 = vector.broadcast %cst_95 : f32 to vector<8x512xf32>
    %c5 = arith.constant 5 : index
    %168 = memref.load %arg8[%c5] : memref<14xf32, #tpu.memory_space<smem>>
    %c0_96 = arith.constant 0 : index
    %c0_97 = arith.constant 0 : index
    %169 = vector.load %arg12[%c0_96, %c0_97] : memref<48x512xf32, #tpu.memory_space<vmem>>, vector<8x512xf32>
    %170 = vector.broadcast %168 : f32 to vector<8x512xf32>
    %171 = arith.mulf %170, %169 : vector<8x512xf32>
    %172 = arith.addf %167, %171 : vector<8x512xf32>
    %173 = vector.extract_strided_slice %166 {offsets = [0, 0], sizes = [8, 512], strides = [1, 1]} : vector<32x512xf32> to vector<8x512xf32>
    %174 = arith.addf %172, %173 : vector<8x512xf32>
    %c6 = arith.constant 6 : index
    %175 = memref.load %arg8[%c6] : memref<14xf32, #tpu.memory_space<smem>>
    %c8_98 = arith.constant 8 : index
    %c0_99 = arith.constant 0 : index
    %176 = vector.load %arg12[%c8_98, %c0_99] : memref<48x512xf32, #tpu.memory_space<vmem>>, vector<8x512xf32>
    %177 = vector.broadcast %175 : f32 to vector<8x512xf32>
    %178 = arith.mulf %177, %176 : vector<8x512xf32>
    %179 = arith.addf %174, %178 : vector<8x512xf32>
    %180 = vector.extract_strided_slice %166 {offsets = [8, 0], sizes = [8, 512], strides = [1, 1]} : vector<32x512xf32> to vector<8x512xf32>
    %181 = arith.addf %179, %180 : vector<8x512xf32>
    %c7 = arith.constant 7 : index
    %182 = memref.load %arg8[%c7] : memref<14xf32, #tpu.memory_space<smem>>
    %c16_100 = arith.constant 16 : index
    %c0_101 = arith.constant 0 : index
    %183 = vector.load %arg12[%c16_100, %c0_101] : memref<48x512xf32, #tpu.memory_space<vmem>>, vector<8x512xf32>
    %184 = vector.broadcast %182 : f32 to vector<8x512xf32>
    %185 = arith.mulf %184, %183 : vector<8x512xf32>
    %186 = arith.addf %181, %185 : vector<8x512xf32>
    %187 = vector.extract_strided_slice %166 {offsets = [16, 0], sizes = [8, 512], strides = [1, 1]} : vector<32x512xf32> to vector<8x512xf32>
    %188 = arith.addf %186, %187 : vector<8x512xf32>
    %c8_102 = arith.constant 8 : index
    %189 = memref.load %arg8[%c8_102] : memref<14xf32, #tpu.memory_space<smem>>
    %c24_103 = arith.constant 24 : index
    %c0_104 = arith.constant 0 : index
    %190 = vector.load %arg12[%c24_103, %c0_104] : memref<48x512xf32, #tpu.memory_space<vmem>>, vector<8x512xf32>
    %191 = vector.broadcast %189 : f32 to vector<8x512xf32>
    %192 = arith.mulf %191, %190 : vector<8x512xf32>
    %193 = arith.addf %188, %192 : vector<8x512xf32>
    %194 = vector.extract_strided_slice %166 {offsets = [24, 0], sizes = [8, 512], strides = [1, 1]} : vector<32x512xf32> to vector<8x512xf32>
    %195 = arith.addf %193, %194 : vector<8x512xf32>
    %c32 = arith.constant 32 : index
    %c0_105 = arith.constant 0 : index
    %196 = vector.load %arg12[%c32, %c0_105] : memref<48x512xf32, #tpu.memory_space<vmem>>, vector<8x512xf32>
    tpu.vector_store %arg12[%c32, %c0_105], %195 {strides = array<i32>} : memref<48x512xf32, #tpu.memory_space<vmem>>, vector<8x512xf32>,
    %cst_106 = arith.constant 0.000000e+00 : f32
    %197 = vector.broadcast %cst_106 : f32 to vector<8x512xf32>
    %198 = arith.maximumf %195, %197 : vector<8x512xf32>
    %c32_107 = arith.constant 32 : index
    %c0_108 = arith.constant 0 : index
    %199 = vector.load %arg11[%c32_107, %c0_108] : memref<40x512xf32, #tpu.memory_space<vmem>>, vector<8x512xf32>
    tpu.vector_store %arg11[%c32_107, %c0_108], %198 {strides = array<i32>} : memref<40x512xf32, #tpu.memory_space<vmem>>, vector<8x512xf32>,
    %c0_109 = arith.constant 0 : index
    %c0_110 = arith.constant 0 : index
    %200 = vector.load %arg11[%c0_109, %c0_110] : memref<40x512xf32, #tpu.memory_space<vmem>>, vector<40x512xf32>
    %c0_111 = arith.constant 0 : index
    %c0_112 = arith.constant 0 : index
    %201 = vector.load %arg6[%c0_111, %c0_112] : memref<40x40xf32, #tpu.memory_space<vmem>>, vector<40x40xf32>
    %cst_113 = arith.constant dense<0.000000e+00> : vector<40x512xf32>
    %202 = tpu.matmul %201, %200, %cst_113 {dimension_numbers = #tpu.dot_dimension_numbers<[1], [0], [0], [1], [0, 0, 1, 1], [], []>} : vector<40x40xf32>, vector<40x512xf32>, vector<40x512xf32> -> vector<40x512xf32>
    %cst_114 = arith.constant dense<0.000000e+00> : vector<40xf32>
    %203 = vector.multi_reduction <add>, %202, %cst_114 [1] : vector<40x512xf32> to vector<40xf32>
    %204 = vector.shape_cast %203 : vector<40xf32> to vector<40x1xf32>
    %205 = arith.mulf %202, %202 : vector<40x512xf32>
    %cst_115 = arith.constant dense<0.000000e+00> : vector<40xf32>
    %206 = vector.multi_reduction <add>, %205, %cst_115 [1] : vector<40x512xf32> to vector<40xf32>
    %207 = vector.shape_cast %206 : vector<40xf32> to vector<40x1xf32>
    %cst_116 = arith.constant 0.001953125 : f32
    %208 = vector.broadcast %cst_116 : f32 to vector<40x1xf32>
    %209 = arith.mulf %204, %208 : vector<40x1xf32>
    %cst_117 = arith.constant 0.001953125 : f32
    %210 = vector.broadcast %cst_117 : f32 to vector<40x1xf32>
    %211 = arith.mulf %207, %210 : vector<40x1xf32>
    %212 = arith.mulf %209, %209 : vector<40x1xf32>
    %213 = arith.subf %211, %212 : vector<40x1xf32>
    %cst_118 = arith.constant 0.000000e+00 : f32
    %214 = vector.broadcast %cst_118 : f32 to vector<40x1xf32>
    %215 = arith.maximumf %213, %214 : vector<40x1xf32>
    %cst_119 = arith.constant 9.99999974E-6 : f32
    %216 = vector.broadcast %cst_119 : f32 to vector<40x1xf32>
    %217 = arith.addf %215, %216 : vector<40x1xf32>
    %218 = math.rsqrt %217 : vector<40x1xf32>
    %c72 = arith.constant 72 : index
    %c0_120 = arith.constant 0 : index
    %219 = vector.load %arg7[%c72, %c0_120] : memref<112x1xf32, #tpu.memory_space<vmem>>, vector<40x1xf32>
    %220 = arith.mulf %218, %219 : vector<40x1xf32>
    %221 = vector.broadcast %209 : vector<40x1xf32> to vector<40x512xf32>
    %222 = arith.subf %202, %221 : vector<40x512xf32>
    %223 = vector.broadcast %220 : vector<40x1xf32> to vector<40x512xf32>
    %224 = arith.mulf %222, %223 : vector<40x512xf32>
    %cst_121 = arith.constant 0.000000e+00 : f32
    %225 = vector.broadcast %cst_121 : f32 to vector<8x512xf32>
    %c9 = arith.constant 9 : index
    %226 = memref.load %arg8[%c9] : memref<14xf32, #tpu.memory_space<smem>>
    %c0_122 = arith.constant 0 : index
    %c0_123 = arith.constant 0 : index
    %227 = vector.load %arg12[%c0_122, %c0_123] : memref<48x512xf32, #tpu.memory_space<vmem>>, vector<8x512xf32>
    %228 = vector.broadcast %226 : f32 to vector<8x512xf32>
    %229 = arith.mulf %228, %227 : vector<8x512xf32>
    %230 = arith.addf %225, %229 : vector<8x512xf32>
    %231 = vector.extract_strided_slice %224 {offsets = [0, 0], sizes = [8, 512], strides = [1, 1]} : vector<40x512xf32> to vector<8x512xf32>
    %232 = arith.addf %230, %231 : vector<8x512xf32>
    %c10 = arith.constant 10 : index
    %233 = memref.load %arg8[%c10] : memref<14xf32, #tpu.memory_space<smem>>
    %c8_124 = arith.constant 8 : index
    %c0_125 = arith.constant 0 : index
    %234 = vector.load %arg12[%c8_124, %c0_125] : memref<48x512xf32, #tpu.memory_space<vmem>>, vector<8x512xf32>
    %235 = vector.broadcast %233 : f32 to vector<8x512xf32>
    %236 = arith.mulf %235, %234 : vector<8x512xf32>
    %237 = arith.addf %232, %236 : vector<8x512xf32>
    %238 = vector.extract_strided_slice %224 {offsets = [8, 0], sizes = [8, 512], strides = [1, 1]} : vector<40x512xf32> to vector<8x512xf32>
    %239 = arith.addf %237, %238 : vector<8x512xf32>
    %c11 = arith.constant 11 : index
    %240 = memref.load %arg8[%c11] : memref<14xf32, #tpu.memory_space<smem>>
    %c16_126 = arith.constant 16 : index
    %c0_127 = arith.constant 0 : index
    %241 = vector.load %arg12[%c16_126, %c0_127] : memref<48x512xf32, #tpu.memory_space<vmem>>, vector<8x512xf32>
    %242 = vector.broadcast %240 : f32 to vector<8x512xf32>
    %243 = arith.mulf %242, %241 : vector<8x512xf32>
    %244 = arith.addf %239, %243 : vector<8x512xf32>
    %245 = vector.extract_strided_slice %224 {offsets = [16, 0], sizes = [8, 512], strides = [1, 1]} : vector<40x512xf32> to vector<8x512xf32>
    %246 = arith.addf %244, %245 : vector<8x512xf32>
    %c12 = arith.constant 12 : index
    %247 = memref.load %arg8[%c12] : memref<14xf32, #tpu.memory_space<smem>>
    %c24_128 = arith.constant 24 : index
    %c0_129 = arith.constant 0 : index
    %248 = vector.load %arg12[%c24_128, %c0_129] : memref<48x512xf32, #tpu.memory_space<vmem>>, vector<8x512xf32>
    %249 = vector.broadcast %247 : f32 to vector<8x512xf32>
    %250 = arith.mulf %249, %248 : vector<8x512xf32>
    %251 = arith.addf %246, %250 : vector<8x512xf32>
    %252 = vector.extract_strided_slice %224 {offsets = [24, 0], sizes = [8, 512], strides = [1, 1]} : vector<40x512xf32> to vector<8x512xf32>
    %253 = arith.addf %251, %252 : vector<8x512xf32>
    %c13 = arith.constant 13 : index
    %254 = memref.load %arg8[%c13] : memref<14xf32, #tpu.memory_space<smem>>
    %c32_130 = arith.constant 32 : index
    %c0_131 = arith.constant 0 : index
    %255 = vector.load %arg12[%c32_130, %c0_131] : memref<48x512xf32, #tpu.memory_space<vmem>>, vector<8x512xf32>
    %256 = vector.broadcast %254 : f32 to vector<8x512xf32>
    %257 = arith.mulf %256, %255 : vector<8x512xf32>
    %258 = arith.addf %253, %257 : vector<8x512xf32>
    %259 = vector.extract_strided_slice %224 {offsets = [32, 0], sizes = [8, 512], strides = [1, 1]} : vector<40x512xf32> to vector<8x512xf32>
    %260 = arith.addf %258, %259 : vector<8x512xf32>
    %c40_132 = arith.constant 40 : index
    %c0_133 = arith.constant 0 : index
    %261 = vector.load %arg12[%c40_132, %c0_133] : memref<48x512xf32, #tpu.memory_space<vmem>>, vector<8x512xf32>
    tpu.vector_store %arg12[%c40_132, %c0_133], %260 {strides = array<i32>} : memref<48x512xf32, #tpu.memory_space<vmem>>, vector<8x512xf32>,
    %c16_134 = arith.constant 16 : index
    %c0_135 = arith.constant 0 : index
    %262 = vector.load %arg12[%c16_134, %c0_135] : memref<48x512xf32, #tpu.memory_space<vmem>>, vector<4x256xf32>
    %c0_136 = arith.constant 0 : index
    %c0_137 = arith.constant 0 : index
    %c0_138 = arith.constant 0 : index
    %263 = vector.load %arg9[%c0_136, %c0_137, %c0_138] : memref<2x16x256xf32, #tpu.memory_space<vmem>>, vector<1x4x256xf32>
    %264 = vector.shape_cast %263 : vector<1x4x256xf32> to vector<4x256xf32>
    %265 = vector.shape_cast %262 : vector<4x256xf32> to vector<1x4x256xf32>
    tpu.vector_store %arg9[%c0_136, %c0_137, %c0_138], %265 {strides = array<i32>} : memref<2x16x256xf32, #tpu.memory_space<vmem>>, vector<1x4x256xf32>,
    %c24_139 = arith.constant 24 : index
    %c0_140 = arith.constant 0 : index
    %266 = vector.load %arg12[%c24_139, %c0_140] : memref<48x512xf32, #tpu.memory_space<vmem>>, vector<4x256xf32>
    %c0_141 = arith.constant 0 : index
    %c4_142 = arith.constant 4 : index
    %c0_143 = arith.constant 0 : index
    %267 = vector.load %arg9[%c0_141, %c4_142, %c0_143] : memref<2x16x256xf32, #tpu.memory_space<vmem>>, vector<1x4x256xf32>
    %268 = vector.shape_cast %267 : vector<1x4x256xf32> to vector<4x256xf32>
    %269 = vector.shape_cast %266 : vector<4x256xf32> to vector<1x4x256xf32>
    tpu.vector_store %arg9[%c0_141, %c4_142, %c0_143], %269 {strides = array<i32>} : memref<2x16x256xf32, #tpu.memory_space<vmem>>, vector<1x4x256xf32>,
    %c32_144 = arith.constant 32 : index
    %c0_145 = arith.constant 0 : index
    %270 = vector.load %arg12[%c32_144, %c0_145] : memref<48x512xf32, #tpu.memory_space<vmem>>, vector<4x256xf32>
    %c0_146 = arith.constant 0 : index
    %c8_147 = arith.constant 8 : index
    %c0_148 = arith.constant 0 : index
    %271 = vector.load %arg9[%c0_146, %c8_147, %c0_148] : memref<2x16x256xf32, #tpu.memory_space<vmem>>, vector<1x4x256xf32>
    %272 = vector.shape_cast %271 : vector<1x4x256xf32> to vector<4x256xf32>
    %273 = vector.shape_cast %270 : vector<4x256xf32> to vector<1x4x256xf32>
    tpu.vector_store %arg9[%c0_146, %c8_147, %c0_148], %273 {strides = array<i32>} : memref<2x16x256xf32, #tpu.memory_space<vmem>>, vector<1x4x256xf32>,
    %c40_149 = arith.constant 40 : index
    %c0_150 = arith.constant 0 : index
    %274 = vector.load %arg12[%c40_149, %c0_150] : memref<48x512xf32, #tpu.memory_space<vmem>>, vector<4x256xf32>
    %c0_151 = arith.constant 0 : index
    %c12_152 = arith.constant 12 : index
    %c0_153 = arith.constant 0 : index
    %275 = vector.load %arg9[%c0_151, %c12_152, %c0_153] : memref<2x16x256xf32, #tpu.memory_space<vmem>>, vector<1x4x256xf32>
    %276 = vector.shape_cast %275 : vector<1x4x256xf32> to vector<4x256xf32>
    %277 = vector.shape_cast %274 : vector<4x256xf32> to vector<1x4x256xf32>
    tpu.vector_store %arg9[%c0_151, %c12_152, %c0_153], %277 {strides = array<i32>} : memref<2x16x256xf32, #tpu.memory_space<vmem>>, vector<1x4x256xf32>,
    %c16_154 = arith.constant 16 : index
    %c256_155 = arith.constant 256 : index
    %278 = vector.load %arg12[%c16_154, %c256_155] : memref<48x512xf32, #tpu.memory_space<vmem>>, vector<4x256xf32>
    %c1_156 = arith.constant 1 : index
    %c0_157 = arith.constant 0 : index
    %c0_158 = arith.constant 0 : index
    %279 = vector.load %arg9[%c1_156, %c0_157, %c0_158] : memref<2x16x256xf32, #tpu.memory_space<vmem>>, vector<1x4x256xf32>
    %280 = vector.shape_cast %279 : vector<1x4x256xf32> to vector<4x256xf32>
    %281 = vector.shape_cast %278 : vector<4x256xf32> to vector<1x4x256xf32>
    tpu.vector_store %arg9[%c1_156, %c0_157, %c0_158], %281 {strides = array<i32>} : memref<2x16x256xf32, #tpu.memory_space<vmem>>, vector<1x4x256xf32>,
    %c24_159 = arith.constant 24 : index
    %c256_160 = arith.constant 256 : index
    %282 = vector.load %arg12[%c24_159, %c256_160] : memref<48x512xf32, #tpu.memory_space<vmem>>, vector<4x256xf32>
    %c1_161 = arith.constant 1 : index
    %c4_162 = arith.constant 4 : index
    %c0_163 = arith.constant 0 : index
    %283 = vector.load %arg9[%c1_161, %c4_162, %c0_163] : memref<2x16x256xf32, #tpu.memory_space<vmem>>, vector<1x4x256xf32>
    %284 = vector.shape_cast %283 : vector<1x4x256xf32> to vector<4x256xf32>
    %285 = vector.shape_cast %282 : vector<4x256xf32> to vector<1x4x256xf32>
    tpu.vector_store %arg9[%c1_161, %c4_162, %c0_163], %285 {strides = array<i32>} : memref<2x16x256xf32, #tpu.memory_space<vmem>>, vector<1x4x256xf32>,
    %c32_164 = arith.constant 32 : index
    %c256_165 = arith.constant 256 : index
    %286 = vector.load %arg12[%c32_164, %c256_165] : memref<48x512xf32, #tpu.memory_space<vmem>>, vector<4x256xf32>
    %c1_166 = arith.constant 1 : index
    %c8_167 = arith.constant 8 : index
    %c0_168 = arith.constant 0 : index
    %287 = vector.load %arg9[%c1_166, %c8_167, %c0_168] : memref<2x16x256xf32, #tpu.memory_space<vmem>>, vector<1x4x256xf32>
    %288 = vector.shape_cast %287 : vector<1x4x256xf32> to vector<4x256xf32>
    %289 = vector.shape_cast %286 : vector<4x256xf32> to vector<1x4x256xf32>
    tpu.vector_store %arg9[%c1_166, %c8_167, %c0_168], %289 {strides = array<i32>} : memref<2x16x256xf32, #tpu.memory_space<vmem>>, vector<1x4x256xf32>,
    %c40_169 = arith.constant 40 : index
    %c256_170 = arith.constant 256 : index
    %290 = vector.load %arg12[%c40_169, %c256_170] : memref<48x512xf32, #tpu.memory_space<vmem>>, vector<4x256xf32>
    %c1_171 = arith.constant 1 : index
    %c12_172 = arith.constant 12 : index
    %c0_173 = arith.constant 0 : index
    %291 = vector.load %arg9[%c1_171, %c12_172, %c0_173] : memref<2x16x256xf32, #tpu.memory_space<vmem>>, vector<1x4x256xf32>
    %292 = vector.shape_cast %291 : vector<1x4x256xf32> to vector<4x256xf32>
    %293 = vector.shape_cast %290 : vector<4x256xf32> to vector<1x4x256xf32>
    tpu.vector_store %arg9[%c1_171, %c12_172, %c0_173], %293 {strides = array<i32>} : memref<2x16x256xf32, #tpu.memory_space<vmem>>, vector<1x4x256xf32>,
    return
  }
}

</mosaic_0001>

<bundles_post_ra>
// kernel: stem_cell_forward.1
= control target key start
LH: loop header
LB: loop body
LE: loop exit
PB: predicated region body
PF: predicated region fallthrough
CT: control target
= control target key end

     0   :  { %14 = vsyncpa [#allocation6], 0  ;;  %s1995_s12 = smov [#allocation5]   ;;  %s2999_s0 = inlined_call_operand.vmem [shape: f32[2,16,256], index: 0, kind: input, shape index: {}]   ;;  %s3000_s1 = inlined_call_operand.vmem [shape: f32[2,16,256], index: 1, kind: input, shape index: {}]   ;;  %s3001_s2 = inlined_call_operand.vmem [shape: f32[16,32], index: 2, kind: input, shape index: {}]   ;;  %s3002_s3 = inlined_call_operand.vmem [shape: f32[16,16], index: 3, kind: input, shape index: {}]   ;;  %s3003_s4 = inlined_call_operand.vmem [shape: f32[24,24], index: 4, kind: input, shape index: {}]   ;;  %s3004_s5 = inlined_call_operand.vmem [shape: f32[32,32], index: 5, kind: input, shape index: {}]   ;;  %s3005_s6 = inlined_call_operand.vmem [shape: f32[40,40], index: 6, kind: input, shape index: {}]   ;;  %s3006_s7 = inlined_call_operand.vmem [shape: f32[112,1], index: 7, kind: input, shape index: {}]   ;;  %s3007_s8 = inlined_call_operand.vmem [shape: f32[14], index: 8, kind: input, shape index: {}]   ;;  %s3008_s9 = inlined_call_operand.vmem [shape: f32[2,16,256], index: 9, kind: output, shape index: {}]  }
   0x1   :  { %s36_s11 = sshll.u32 %s3007_s8, 4  ;;  %s37_s11 = int_to_ptr.vmem [resolvable:$true] %s36_s11 }
   0x2   :  { %39 = dma.vmem_to_smem %s37_s11, 16, %s1995_s12, [#allocation6]  }
   0x3   :  { %1993 = dma.done.wait [#allocation6], 16  }
   0x4   :  { %1994 = vsyncadd [#allocation6], 4294967280 }
   0x5   :  { %44 = sfence }
   0x6   :  { %v1857_v0 = vld [vmem:[%s3000_s1 + $0x30] sm:$0xff]  ;;  %v1855_v1 = vld [vmem:[%s3000_s1 + $0x20] sm:$0xff]  ;;  %v1858_v2 = vld [vmem:[%s3000_s1 + $0x38] sm:$0xff]  ;;  %vm113_vm0 = vcmask 261120   ;;  %vm322_vm7 = vcmask 130048   ;;  %s511_s30 = sld [smem:[#allocation5]] }
   0x7   :  { %v89_v3 = vmax.f32 %v1857_v0, 0.0  ;;  %v87_v4 = vmax.f32 %v1855_v1, 0.0  ;;  %v90_v5 = vmax.f32 %v1858_v2, 0.0  ;;  %v59_v6 = vld [vmem:[%s3000_s1 + $0x10] sm:$0xff]  ;;  %v60_v7 = vld [vmem:[%s3000_s1 + $0x18] sm:$0xff]  ;;  %v1856_v11 = vld [vmem:[%s3000_s1 + $0x28] sm:$0xff] }
   0x8   :  { %v1853_v8 = vld [vmem:[%s2999_s0 + $0x30] sm:$0xff]  ;;  %v63_v9 = vmax.f32 %v59_v6, 0.0  ;;  %v64_v10 = vmax.f32 %v60_v7, 0.0  ;;  %v57_v12 = vld [vmem:[%s3000_s1] sm:$0xff]  ;;  %v58_v13 = vld [vmem:[%s3000_s1 + $0x8] sm:$0xff]  ;;  %v88_v15 = vmax.f32 %v1856_v11, 0.0 }
   0x9   :  { %178 = vmatpush.msra.mxu2 %v89_v3  ;;  %201 = vmatpush.msra.mxu3 %v90_v5  ;;  %v76_v14 = vmax.f32 %v1853_v8, 0.0  ;;  %v61_v16 = vmax.f32 %v57_v12, 0.0  ;;  %v62_v17 = vmax.f32 %v58_v13, 0.0  ;;  %v1851_v18 = vld [vmem:[%s2999_s0 + $0x20] sm:$0xff]  ;;  %v1854_v19 = vld [vmem:[%s2999_s0 + $0x38] sm:$0xff]  ;;  %v47_v21 = vld [vmem:[%s2999_s0 + $0x10] sm:$0xff] }
   0xa   :  { %132 = vmatpush.msra.mxu0 %v63_v9  ;;  %155 = vmatpush.msra.mxu1 %v64_v10  ;;  %v77_v20 = vmax.f32 %v1854_v19, 0.0  ;;  %v48_v22 = vld [vmem:[%s2999_s0 + $0x18] sm:$0xff]  ;;  %v1852_v23 = vld [vmem:[%s2999_s0 + $0x28] sm:$0xff]  ;;  %v74_v24 = vmax.f32 %v1851_v18, 0.0  ;;  %v51_v25 = vmax.f32 %v47_v21, 0.0  ;;  %v45_v28 = vld [vmem:[%s2999_s0] sm:$0xff] }
   0xb   :  { %179 = vmatpush.msra.mxu2 %v87_v4  ;;  %202 = vmatpush.msra.mxu3 %v88_v15  ;;  %v52_v26 = vmax.f32 %v48_v22, 0.0  ;;  %v75_v27 = vmax.f32 %v1852_v23, 0.0  ;;  %v46_v29 = vld [vmem:[%s2999_s0 + $0x8] sm:$0xff]  ;;  %v95_v30 = vld [vmem:[%s3001_s2] sm:$0xff]  ;;  %v49_v31 = vmax.f32 %v45_v28, 0.0  ;;  %s1875_s10 = sld [smem:[#allocation5 + $0x1]] }
   0xc   :  { %133 = vmatpush.msra.mxu0 %v61_v16  ;;  %156 = vmatpush.msra.mxu1 %v62_v17  ;;  %v50_v32 = vmax.f32 %v46_v29, 0.0  ;;  %v96_v33 = vld [vmem:[%s3001_s2 + $0x8] sm:$0xff]  ;;  %vm574_vm14 = vcmask 195584   ;;  %s1888_s26 = sld [smem:[#allocation5 + $0x2]] }
   0xd   :  { %180 = vmatpush.msra.mxu2 %v76_v14  ;;  %203 = vmatpush.msra.mxu3 %v77_v20  ;;  %s1890_s27 = sld [smem:[#allocation5 + $0x4]] }
   0xe   :  { %134 = vmatpush.msra.mxu0 %v51_v25  ;;  %157 = vmatpush.msra.mxu1 %v52_v26  ;;  %s1908_s25 = sld [smem:[#allocation5 + $0x6]] }
   0xf   :  { %181 = vmatpush.msra.mxu2 %v74_v24  ;;  %204 = vmatpush.msra.mxu3 %v75_v27  ;;  %s1932_s28 = sld [smem:[#allocation5 + $0xa]] }
  0x10   :  { %1863 = vmatmul.msk.f32.vlgmr.msra.gmra.mxu2 %vm113_vm0, %v95_v30  ;;  %1865 = vmatmul.msk.f32.vlgmr.msra.gmra.mxu3 %vm113_vm0, %v95_v30  ;;  %s1934_s29 = sld [smem:[#allocation5 + $0xc]] }
  0x11   :  { %135 = vmatpush.msra.mxu0 %v49_v31  ;;  %158 = vmatpush.msra.mxu1 %v50_v32 }
  0x12   :  { %1859 = vmatmul.msk.f32.vlgmr.msra.gmra.mxu0 %vm113_vm0, %v95_v30  ;;  %1861 = vmatmul.msk.f32.vlgmr.msra.gmra.mxu1 %vm113_vm0, %v95_v30 }
  0x18   :  { %1864 = vmatmul.msk.f32.gmra.mxu2 %vm113_vm0, %v96_v33  ;;  %1866 = vmatmul.msk.f32.gmra.mxu3 %vm113_vm0, %v96_v33 }
  0x1a   :  { %1860 = vmatmul.msk.f32.gmra.mxu0 %vm113_vm0, %v96_v33  ;;  %1862 = vmatmul.msk.f32.gmra.mxu1 %vm113_vm0, %v96_v33 }
  0x8f   :  { %v2112_v34 = vpop.f32.mrf.mxu0  ;;  %v2114_v35 = vpop.f32.mrf.mxu1 }
  0x90   :  { %v222_v44 = vmul.f32 %v2112_v34, %v2112_v34  ;;  %v223_v47 = vmul.f32 %v2114_v35, %v2114_v35  ;;  %v212_v51 = vadd.f32 %v2114_v35, %v2112_v34 }
  0x92   :  { %v230_v56 = vadd.f32 %v223_v47, %v222_v44 }
  0x93   :  { %v2116_v36 = vpop.f32.mrf.mxu2  ;;  %v2118_v37 = vpop.f32.mrf.mxu3 }
  0x94   :  { %v224_v54 = vmul.f32 %v2116_v36, %v2116_v36  ;;  %v213_v57 = vadd.f32 %v212_v51, %v2116_v36  ;;  %v225_v58 = vmul.f32 %v2118_v37, %v2118_v37 }
  0x96   :  { %v231_v59 = vadd.f32 %v230_v56, %v224_v54  ;;  %v214_v60 = vadd.f32 %v213_v57, %v2118_v37 }
  0x97   :  { %v2120_v38 = vpop.f32.mrf.mxu0  ;;  %v2122_v39 = vpop.f32.mrf.mxu1 }
  0x98   :  { %v226_v40 = vmul.f32 %v2120_v38, %v2120_v38  ;;  %v217_v41 = vadd.f32 %v2122_v39, %v2120_v38  ;;  %v227_v42 = vmul.f32 %v2122_v39, %v2122_v39  ;;  %v232_v61 = vadd.f32 %v231_v59, %v225_v58 }
  0x9a   :  { %v235_v43 = vadd.f32 %v227_v42, %v226_v40 }
  0x9b   :  { %v186_v45 = vpop.f32.mrf.mxu2  ;;  %v209_v46 = vpop.f32.mrf.mxu3 }
  0x9c   :  { %v228_v48 = vmul.f32 %v186_v45, %v186_v45  ;;  %v218_v49 = vadd.f32 %v217_v41, %v186_v45  ;;  %v229_v50 = vmul.f32 %v209_v46, %v209_v46 }
  0x9e   :  { %v219_v52 = vadd.f32 %v218_v49, %v209_v46  ;;  %v236_v53 = vadd.f32 %v235_v43, %v228_v48 }
  0xa0   :  { %220 = vadd.xlane.f32.xlu0 %v219_v52  ;;  %v237_v55 = vadd.f32 %v236_v53, %v229_v50  ;;  %v321_v53 = vld [vmem:[%s3002_s3 + $0x8] sm:$0xff] }
  0xa2   :  { %238 = vadd.xlane.f32.xlu1 %v237_v55 }
  0xa8   :  { %215 = vadd.xlane.f32.xlu0 %v214_v60 }
  0xaa   :  { %233 = vadd.xlane.f32.xlu1 %v232_v61 }
 0x113   :  { %v221_v62 = vpop.xlane.xlu0 %220 }
 0x114   :  { %v241_v63 = vmul.f32 0.001953125, %v221_v62 }
 0x115   :  { %v239_v0 = vpop.xlane.xlu1 %238 }
 0x116   :  { %v243_v1 = vmul.f32 0.001953125, %v239_v0  ;;  %v245_v2 = vmul.f32 %v241_v63, %v241_v63  ;;  %v276_v22 = vsub.f32 %v2120_v38, %v241_v63  ;;  %v277_v23 = vsub.f32 %v2122_v39, %v241_v63 }
 0x117   :  { %v278_v24 = vsub.f32 %v186_v45, %v241_v63  ;;  %v279_v25 = vsub.f32 %v209_v46, %v241_v63 }
 0x118   :  { %v247_v3 = vsub.f32 %v243_v1, %v245_v2 }
 0x11a   :  { %v249_v4 = vmax.f32 %v247_v3, 0.0 }
 0x11b   :  { %v216_v5 = vpop.xlane.xlu0 %215 }
 0x11c   :  { %v251_v6 = vadd.f32 1e-05, %v249_v4  ;;  %v240_v7 = vmul.f32 0.001953125, %v216_v5 }
 0x11d   :  { %v234_v8 = vpop.xlane.xlu1 %233 }
 0x11e   :  { %1949 = vrsqrt.f32 %v251_v6  ;;  %v242_v9 = vmul.f32 0.001953125, %v234_v8  ;;  %v244_v10 = vmul.f32 %v240_v7, %v240_v7  ;;  %vm268_vm2 = vweird.f32 %v251_v6 }
 0x11f   :  { %v272_v43 = vsub.f32 %v2112_v34, %v240_v7  ;;  %v273_v44 = vsub.f32 %v2114_v35, %v240_v7  ;;  %v274_v45 = vsub.f32 %v2116_v36, %v240_v7  ;;  %v275_v46 = vsub.f32 %v2118_v37, %v240_v7  ;;  %v320_v37 = vld [vmem:[%s3002_s3] sm:$0xff]  ;;  %s1889_s3 = sld [smem:[#allocation5 + $0x3]] }
 0x120   :  { %v246_v11 = vsub.f32 %v242_v9, %v244_v10 }
 0x122   :  { %v248_v12 = vmax.f32 %v246_v11, 0.0 }
 0x124   :  { %v1950_v13 = vpop.eup %1949  ;;  %v250_v14 = vadd.f32 1e-05, %v248_v12 }
 0x125   :  { %v263_v15 = vmul.f32 %v1950_v13, %v251_v6  ;;  %vm269_vm1 = vweird.f32 %v1950_v13 }
 0x126   :  { %1951 = vrsqrt.f32 %v250_v14  ;;  %vm270_vm3 = vmor %vm268_vm2, %vm269_vm1  ;;  %vm258_vm5 = vweird.f32 %v250_v14 }
 0x127   :  { %v264_v16 = vmul.f32 %v1950_v13, %v263_v15 }
 0x129   :  { %v265_v17 = vmul.f32 0.5, %v264_v16 }
 0x12b   :  { %v266_v18 = vsub.f32 1.5, %v265_v17 }
 0x12c   :  { %v1952_v19 = vpop.eup %1951 }
 0x12d   :  { %v267_v20 = vmul.f32 %v1950_v13, %v266_v18  ;;  %v253_v21 = vmul.f32 %v1952_v19, %v250_v14  ;;  %vm259_vm4 = vweird.f32 %v1952_v19 }
 0x12e   :  { %vm260_vm6 = vmor %vm258_vm5, %vm259_vm4 }
 0x12f   :  { %v271_v26 = vsel %vm270_vm3, %v1950_v13, %v267_v20  ;;  %v254_v27 = vmul.f32 %v1952_v19, %v253_v21 }
 0x130   :  { %v2144_v28 = vmul.f32 %v276_v22, %v271_v26  ;;  %v2146_v29 = vmul.f32 %v277_v23, %v271_v26  ;;  %v2148_v30 = vmul.f32 %v278_v24, %v271_v26  ;;  %v2150_v31 = vmul.f32 %v279_v25, %v271_v26 }
 0x131   :  { %v255_v32 = vmul.f32 0.5, %v254_v27 }
 0x132   :  { %292 = vst [vmem:[#allocation4 + $0x60] sm:$0xff] %v2144_v28  ;;  %v2154_v33 = vmax.f32 %v2144_v28, 0.0  ;;  %v2157_v38 = vmax.f32 %v2146_v29, 0.0  ;;  %v2160_v39 = vmax.f32 %v2148_v30, 0.0  ;;  %v2163_v40 = vmax.f32 %v2150_v31, 0.0 }
 0x133   :  { %v256_v41 = vsub.f32 1.5, %v255_v32  ;;  %293 = vst [vmem:[#allocation4 + $0x28] sm:$0xff] %v2146_v29 }
 0x134   :  { %343 = vmatpush.msrb.mxu0 %v2154_v33  ;;  %366 = vmatpush.msrb.mxu1 %v2157_v38  ;;  %294 = vst [vmem:[#allocation4 + $0x40] sm:$0xff] %v2148_v30 }
 0x135   :  { %v257_v42 = vmul.f32 %v1952_v19, %v256_v41  ;;  %389 = vmatpush.msrb.mxu2 %v2160_v39  ;;  %295 = vst [vmem:[#allocation4 + $0x78] sm:$0xff] %v2150_v31  ;;  %412 = vmatpush.msrb.mxu3 %v2163_v40 }
 0x137   :  { %v261_v47 = vsel %vm260_vm6, %v1952_v19, %v257_v42  ;;  %v1996_v19 = vmov 0  }
 0x138   :  { %v2176_v48 = vmul.f32 %v272_v43, %v261_v47  ;;  %v2178_v49 = vmul.f32 %v273_v44, %v261_v47  ;;  %v2180_v50 = vmul.f32 %v274_v45, %v261_v47  ;;  %v2182_v51 = vmul.f32 %v275_v46, %v261_v47  ;;  %1946 = vset.pattern.permute.xlu2 %v1996_v19 }
 0x139   :  { %1947 = vset.pattern.permute.xlu0 %v1996_v19  ;;  %1948 = vset.pattern.permute.xlu1 %v1996_v19 }
 0x13a   :  { %288 = vst [vmem:[#allocation4 + $0xb0] sm:$0xff] %v2176_v48  ;;  %v2186_v52 = vmax.f32 %v2176_v48, 0.0  ;;  %v2189_v34 = vmax.f32 %v2178_v49, 0.0  ;;  %v2192_v35 = vmax.f32 %v2180_v50, 0.0  ;;  %v2195_v36 = vmax.f32 %v2182_v51, 0.0 }
 0x13b   :  { %289 = vst [vmem:[#allocation4] sm:$0xff] %v2178_v49 }
 0x13c   :  { %3022 = vst [vmem:[#allocation8_spill] sm:$0xff] %v2195_v36  ;;  %344 = vmatpush.msrb.mxu0 %v2186_v52  ;;  %367 = vmatpush.msrb.mxu1 %v2189_v34 }
 0x13d   :  { %290 = vst [vmem:[#allocation4 + $0x10] sm:$0xff] %v2180_v50  ;;  %390 = vmatpush.msrb.mxu2 %v2192_v35  ;;  %413 = vmatpush.msrb.mxu3 %v2195_v36 }
 0x13e   :  { %291 = vst [vmem:[#allocation4 + $0x48] sm:$0xff] %v2182_v51  ;;  %1871 = vmatmul.msk.f32.vlgmr.msrb.gmra.mxu2 %vm322_vm7, %v320_v37  ;;  %1873 = vmatmul.msk.f32.vlgmr.msrb.gmra.mxu3 %vm322_vm7, %v320_v37 }
 0x13f   :  { %1867 = vmatmul.msk.f32.vlgmr.msrb.gmra.mxu0 %vm322_vm7, %v320_v37  ;;  %1869 = vmatmul.msk.f32.vlgmr.msrb.gmra.mxu1 %vm322_vm7, %v320_v37 }
 0x146   :  { %1872 = vmatmul.msk.f32.gmra.mxu2 %vm322_vm7, %v321_v53  ;;  %1874 = vmatmul.msk.f32.gmra.mxu3 %vm322_vm7, %v321_v53 }
 0x147   :  { %1868 = vmatmul.msk.f32.gmra.mxu0 %vm322_vm7, %v321_v53  ;;  %1870 = vmatmul.msk.f32.gmra.mxu1 %vm322_vm7, %v321_v53 }
 0x1bc   :  { %v2210_v54 = vpop.f32.mrf.mxu0  ;;  %v2212_v55 = vpop.f32.mrf.mxu1 }
 0x1bd   :  { %v421_v56 = vadd.f32 %v2212_v55, %v2210_v54  ;;  %v431_v57 = vmul.f32 %v2210_v54, %v2210_v54  ;;  %v432_v58 = vmul.f32 %v2212_v55, %v2212_v55 }
 0x1bf   :  { %v439_v2 = vadd.f32 %v432_v58, %v431_v57 }
 0x1c1   :  { %v2220_v59 = vpop.f32.mrf.mxu2  ;;  %v2222_v60 = vpop.f32.mrf.mxu3 }
 0x1c2   :  { %v422_v61 = vadd.f32 %v421_v56, %v2220_v59  ;;  %v433_v62 = vmul.f32 %v2220_v59, %v2220_v59  ;;  %v434_v6 = vmul.f32 %v2222_v60, %v2222_v60 }
 0x1c4   :  { %v423_v63 = vadd.f32 %v422_v61, %v2222_v60  ;;  %v2228_v0 = vpop.f32.mrf.mxu0  ;;  %v2230_v1 = vpop.f32.mrf.mxu1  ;;  %v440_v7 = vadd.f32 %v439_v2, %v433_v62 }
 0x1c5   :  { %v435_v3 = vmul.f32 %v2228_v0, %v2228_v0  ;;  %v436_v4 = vmul.f32 %v2230_v1, %v2230_v1  ;;  %v426_v5 = vadd.f32 %v2230_v1, %v2228_v0 }
 0x1c6   :  { %424 = vadd.xlane.f32.xlu2 %v423_v63  ;;  %v441_v14 = vadd.f32 %v440_v7, %v434_v6  ;;  %v482_v7 = vld [vmem:[%s3006_s7 + $0x8] sm:$0xff] }
 0x1c7   :  { %v444_v8 = vadd.f32 %v436_v4, %v435_v3  ;;  %v481_v4 = vld [vmem:[%s3006_s7] sm:$0xff] }
 0x1c9   :  { %v2240_v9 = vpop.f32.mrf.mxu2  ;;  %v2242_v10 = vpop.f32.mrf.mxu3 }
 0x1ca   :  { %v437_v11 = vmul.f32 %v2240_v9, %v2240_v9  ;;  %v427_v12 = vadd.f32 %v426_v5, %v2240_v9  ;;  %v438_v13 = vmul.f32 %v2242_v10, %v2242_v10 }
 0x1cc   :  { %v428_v15 = vadd.f32 %v427_v12, %v2242_v10  ;;  %v445_v16 = vadd.f32 %v444_v8, %v437_v11 }
 0x1ce   :  { %442 = vadd.xlane.f32.xlu2 %v441_v14  ;;  %429 = vadd.xlane.f32.xlu0 %v428_v15  ;;  %v446_v17 = vadd.f32 %v445_v16, %v438_v13  ;;  %v516_v13 = vstv %s511_s30  ;;  %v534_v14 = vstv %s1875_s10  ;;  %s2948_s30 = sld [smem:[#allocation5 + $0xd]] }
 0x1cf   :  { %v518_v19 = vmul.f32 %v516_v13, %v2178_v49 }
 0x1d0   :  { %447 = vadd.xlane.f32.xlu1 %v446_v17 }
 0x239   :  { %v425_v18 = vpop.xlane.xlu2 %424 }
 0x23a   :  { %v449_v20 = vmul.f32 0.001953125, %v425_v18 }
 0x23c   :  { %v453_v23 = vmul.f32 %v449_v20, %v449_v20  ;;  %v485_v15 = vsub.f32 %v2210_v54, %v449_v20  ;;  %v486_v16 = vsub.f32 %v2212_v55, %v449_v20  ;;  %v487_v17 = vsub.f32 %v2220_v59, %v449_v20 }
 0x23d   :  { %v488_v18 = vsub.f32 %v2222_v60, %v449_v20  ;;  %v535_v54 = vmul.f32 %v534_v14, %v2144_v28  ;;  %v536_v55 = vmul.f32 %v534_v14, %v2146_v29  ;;  %v537_v59 = vmul.f32 %v534_v14, %v2148_v30 }
 0x23e   :  { %v538_v60 = vmul.f32 %v534_v14, %v2150_v31  ;;  %v572_v14 = vld [vmem:[%s3003_s4 + $0x8] sm:$0xff] }
 0x241   :  { %v443_v21 = vpop.xlane.xlu2 %442  ;;  %v430_v22 = vpop.xlane.xlu0 %429 }
 0x242   :  { %v451_v24 = vmul.f32 0.001953125, %v443_v21  ;;  %v2250_v25 = vmul.f32 0.001953125, %v430_v22  ;;  %v519_v21 = vmul.f32 %v516_v13, %v2180_v50  ;;  %v520_v22 = vmul.f32 %v516_v13, %v2182_v51 }
 0x243   :  { %v448_v26 = vpop.xlane.xlu1 %447 }
 0x244   :  { %v455_v27 = vsub.f32 %v451_v24, %v453_v23  ;;  %v452_v32 = vmul.f32 0.001953125, %v448_v26  ;;  %v454_v41 = vmul.f32 %v2250_v25, %v2250_v25  ;;  %v517_v24 = vmul.f32 %v516_v13, %v2176_v48 }
 0x246   :  { %v457_v42 = vmax.f32 %v455_v27, 0.0  ;;  %v456_v43 = vsub.f32 %v452_v32, %v454_v41 }
 0x248   :  { %v459_v44 = vadd.f32 1e-05, %v457_v42  ;;  %v458_v45 = vmax.f32 %v456_v43, 0.0 }
 0x24a   :  { %1953 = vrsqrt.f32 %v459_v44  ;;  %v460_v46 = vadd.f32 1e-05, %v458_v45  ;;  %vm467_vm9 = vweird.f32 %v459_v44 }
 0x24c   :  { %1955 = vrsqrt.f32 %v460_v46  ;;  %vm477_vm12 = vweird.f32 %v460_v46 }
 0x250   :  { %v1954_v47 = vpop.eup %1953 }
 0x251   :  { %v462_v37 = vmul.f32 %v1954_v47, %v459_v44  ;;  %vm468_vm8 = vweird.f32 %v1954_v47 }
 0x252   :  { %v1956_v53 = vpop.eup %1955  ;;  %vm469_vm11 = vmor %vm467_vm9, %vm468_vm8 }
 0x253   :  { %v463_v56 = vmul.f32 %v1954_v47, %v462_v37  ;;  %v472_v57 = vmul.f32 %v1956_v53, %v460_v46  ;;  %vm478_vm10 = vweird.f32 %v1956_v53 }
 0x254   :  { %vm479_vm13 = vmor %vm477_vm12, %vm478_vm10 }
 0x255   :  { %v464_v58 = vmul.f32 0.5, %v463_v56  ;;  %v473_v61 = vmul.f32 %v1956_v53, %v472_v57  ;;  %v490_v56 = vsub.f32 %v2230_v1, %v2250_v25  ;;  %v491_v57 = vsub.f32 %v2240_v9, %v2250_v25 }
 0x257   :  { %v465_v62 = vsub.f32 1.5, %v464_v58  ;;  %v474_v63 = vmul.f32 0.5, %v473_v61  ;;  %v492_v58 = vsub.f32 %v2242_v10, %v2250_v25 }
 0x259   :  { %v475_v2 = vsub.f32 1.5, %v474_v63  ;;  %v466_v3 = vmul.f32 %v1954_v47, %v465_v62 }
 0x25b   :  { %v470_v5 = vsel %vm469_vm11, %v1954_v47, %v466_v3  ;;  %v476_v6 = vmul.f32 %v1956_v53, %v475_v2 }
 0x25c   :  { %v483_v8 = vmul.f32 %v481_v4, %v470_v5 }
 0x25d   :  { %v480_v11 = vsel %vm479_vm13, %v1956_v53, %v476_v6  ;;  %v489_v53 = vsub.f32 %v2228_v0, %v2250_v25 }
 0x25e   :  { %495 = vperm.xlu2 %1946, %v483_v8   ;;  %v484_v12 = vmul.f32 %v482_v7, %v480_v11  ;;  %v571_v7 = vld [vmem:[%s3003_s4] sm:$0xff] }
 0x260   :  { %500 = vperm.xlu0 %1947, %v484_v12  }
 0x2b8   :  { %v496_v23 = vpop.permute.xlu2 %495 }
 0x2b9   :  { %v503_v26 = vmul.f32 %v496_v23, %v485_v15  ;;  %v504_v27 = vmul.f32 %v496_v23, %v486_v16  ;;  %v505_v32 = vmul.f32 %v496_v23, %v487_v17  ;;  %v506_v41 = vmul.f32 %v496_v23, %v488_v18  ;;  %v573_v15 = vld [vmem:[%s3003_s4 + $0x10] sm:$0xff] }
 0x2bb   :  { %v525_v20 = vadd.f32 %v517_v24, %v503_v26  ;;  %v526_v42 = vadd.f32 %v518_v19, %v504_v27  ;;  %v527_v43 = vadd.f32 %v519_v21, %v505_v32  ;;  %v528_v44 = vadd.f32 %v520_v22, %v506_v41 }
 0x2bd   :  { %v540_v45 = vadd.f32 %v536_v55, %v526_v42  ;;  %v541_v46 = vadd.f32 %v537_v59, %v527_v43  ;;  %v542_v47 = vadd.f32 %v538_v60, %v528_v44  ;;  %v539_v37 = vadd.f32 %v535_v54, %v525_v20 }
 0x2d2   :  { %v501_v61 = vpop.permute.xlu0 %500 }
 0x2d3   :  { %v507_v62 = vmul.f32 %v501_v61, %v489_v53  ;;  %v508_v63 = vmul.f32 %v501_v61, %v490_v56  ;;  %v509_v2 = vmul.f32 %v501_v61, %v491_v57  ;;  %v510_v3 = vmul.f32 %v501_v61, %v492_v58 }
 0x2d5   :  { %v2280_v4 = vadd.f32 %v539_v37, %v507_v62  ;;  %v2282_v5 = vadd.f32 %v540_v45, %v508_v63  ;;  %v2284_v6 = vadd.f32 %v541_v46, %v509_v2  ;;  %v2286_v0 = vadd.f32 %v542_v47, %v510_v3 }
 0x2d7   :  { %547 = vst [vmem:[#allocation4 + $0x88] sm:$0xff] %v2280_v4  ;;  %v2290_v1 = vmax.f32 %v2280_v4, 0.0  ;;  %v2293_v9 = vmax.f32 %v2282_v5, 0.0  ;;  %v2296_v10 = vmax.f32 %v2284_v6, 0.0  ;;  %v2299_v25 = vmax.f32 %v2286_v0, 0.0 }
 0x2d8   :  { %548 = vst [vmem:[#allocation4 + $0x90] sm:$0xff] %v2282_v5 }
 0x2d9   :  { %549 = vst [vmem:[#allocation4 + $0x18] sm:$0xff] %v2284_v6  ;;  %597 = vmatpush.msra.mxu0 %v2290_v1  ;;  %623 = vmatpush.msra.mxu1 %v2293_v9 }
 0x2da   :  { %550 = vst [vmem:[#allocation4 + $0x98] sm:$0xff] %v2286_v0  ;;  %649 = vmatpush.msra.mxu2 %v2296_v10  ;;  %675 = vmatpush.msra.mxu3 %v2299_v25 }
 0x2db   :  { %598 = vmatpush.msra.mxu0 %v2154_v33  ;;  %624 = vmatpush.msra.mxu1 %v2157_v38 }
 0x2dc   :  { %650 = vmatpush.msra.mxu2 %v2160_v39  ;;  %676 = vmatpush.msra.mxu3 %v2163_v40 }
 0x2dd   :  { %599 = vmatpush.msra.mxu0 %v2186_v52  ;;  %625 = vmatpush.msra.mxu1 %v2189_v34 }
 0x2de   :  { %v1789_v8 = vld [vmem:[#allocation4 + $0x88] sm:$0xf]  ;;  %651 = vmatpush.msra.mxu2 %v2192_v35  ;;  %677 = vmatpush.msra.mxu3 %v2195_v36 }
 0x2df   :  { %v1790_v11 = vld [vmem:[#allocation4 + $0x90] sm:$0xf]  ;;  %1791 = vst [vmem:[%s3008_s9] sm:$0xf] %v1789_v8  ;;  %1882 = vmatmul.msk.f32.vlgmr.msra.gmra.mxu2 %vm574_vm14, %v571_v7  ;;  %1885 = vmatmul.msk.f32.vlgmr.msra.gmra.mxu3 %vm574_vm14, %v571_v7 }
 0x2e0   :  { %1792 = vst [vmem:[%s3008_s9 + $0x8] sm:$0xf] %v1790_v11  ;;  %v1817_v12 = vld [vmem:[#allocation4 + $0x18] sm:$0xf]  ;;  %1876 = vmatmul.msk.f32.vlgmr.msra.gmra.mxu0 %vm574_vm14, %v571_v7  ;;  %1879 = vmatmul.msk.f32.vlgmr.msra.gmra.mxu1 %vm574_vm14, %v571_v7 }
 0x2e1   :  { %v1818_v13 = vld [vmem:[#allocation4 + $0x98] sm:$0xf]  ;;  %1936 = vst [vmem:[%s3008_s9 + $0x20] sm:$0xf] %v1817_v12 }
 0x2e2   :  { %1937 = vst [vmem:[%s3008_s9 + $0x28] sm:$0xf] %v1818_v13 }
 0x2e7   :  { %1883 = vmatmul.msk.f32.gmra.mxu2 %vm574_vm14, %v572_v14  ;;  %1886 = vmatmul.msk.f32.gmra.mxu3 %vm574_vm14, %v572_v14 }
 0x2e8   :  { %1877 = vmatmul.msk.f32.gmra.mxu0 %vm574_vm14, %v572_v14  ;;  %1880 = vmatmul.msk.f32.gmra.mxu1 %vm574_vm14, %v572_v14 }
 0x2ef   :  { %1884 = vmatmul.msk.f32.gmra.mxu2 %vm574_vm14, %v573_v15  ;;  %1887 = vmatmul.msk.f32.gmra.mxu3 %vm574_vm14, %v573_v15 }
 0x2f0   :  { %1878 = vmatmul.msk.f32.gmra.mxu0 %vm574_vm14, %v573_v15  ;;  %1881 = vmatmul.msk.f32.gmra.mxu1 %vm574_vm14, %v573_v15 }
 0x35d   :  { %v2349_v16 = vpop.f32.mrf.mxu0  ;;  %v2351_v17 = vpop.f32.mrf.mxu1 }
 0x35e   :  { %v688_v18 = vadd.f32 %v2351_v17, %v2349_v16  ;;  %v703_v19 = vmul.f32 %v2349_v16, %v2349_v16  ;;  %v704_v21 = vmul.f32 %v2351_v17, %v2351_v17 }
 0x360   :  { %v715_v32 = vadd.f32 %v704_v21, %v703_v19 }
 0x362   :  { %v2359_v22 = vpop.f32.mrf.mxu2  ;;  %v2361_v23 = vpop.f32.mrf.mxu3 }
 0x363   :  { %v689_v24 = vadd.f32 %v688_v18, %v2359_v22  ;;  %v705_v26 = vmul.f32 %v2359_v22, %v2359_v22  ;;  %v706_v60 = vmul.f32 %v2361_v23, %v2361_v23 }
 0x365   :  { %v690_v27 = vadd.f32 %v689_v24, %v2361_v23  ;;  %v2367_v41 = vpop.f32.mrf.mxu0  ;;  %v2369_v54 = vpop.f32.mrf.mxu1  ;;  %v716_v20 = vadd.f32 %v715_v32, %v705_v26 }
 0x366   :  { %v707_v55 = vmul.f32 %v2367_v41, %v2367_v41  ;;  %v708_v59 = vmul.f32 %v2369_v54, %v2369_v54  ;;  %v693_v45 = vadd.f32 %v2369_v54, %v2367_v41 }
 0x367   :  { %691 = vadd.xlane.f32.xlu1 %v690_v27  ;;  %v717_v37 = vadd.f32 %v716_v20, %v706_v60 }
 0x368   :  { %v720_v42 = vadd.f32 %v708_v59, %v707_v55 }
 0x36a   :  { %v2377_v43 = vpop.f32.mrf.mxu2  ;;  %v2379_v44 = vpop.f32.mrf.mxu3 }
 0x36b   :  { %v709_v46 = vmul.f32 %v2377_v43, %v2377_v43  ;;  %v710_v47 = vmul.f32 %v2379_v44, %v2379_v44  ;;  %v694_v56 = vadd.f32 %v693_v45, %v2377_v43 }
 0x36d   :  { %v721_v53 = vadd.f32 %v720_v42, %v709_v46  ;;  %v2388_v58 = vpop.f32.mrf.mxu0  ;;  %v2390_v61 = vpop.f32.mrf.mxu1  ;;  %v695_v62 = vadd.f32 %v694_v56, %v2379_v44 }
 0x36e   :  { %v698_v63 = vadd.f32 %v2390_v61, %v2388_v58  ;;  %v711_v8 = vmul.f32 %v2388_v58, %v2388_v58  ;;  %v712_v11 = vmul.f32 %v2390_v61, %v2390_v61 }
 0x36f   :  { %718 = vadd.xlane.f32.xlu1 %v717_v37  ;;  %v722_v57 = vadd.f32 %v721_v53, %v710_v47 }
 0x370   :  { %v725_v14 = vadd.f32 %v712_v11, %v711_v8 }
 0x371   :  { %723 = vadd.xlane.f32.xlu2 %v722_v57 }
 0x372   :  { %v2395_v2 = vpop.f32.mrf.mxu2  ;;  %v2398_v7 = vpop.f32.mrf.mxu3 }
 0x373   :  { %v699_v3 = vadd.f32 %v698_v63, %v2395_v2  ;;  %v713_v13 = vmul.f32 %v2395_v2, %v2395_v2  ;;  %v714_v15 = vmul.f32 %v2398_v7, %v2398_v7 }
 0x375   :  { %v700_v12 = vadd.f32 %v699_v3, %v2398_v7  ;;  %v726_v18 = vadd.f32 %v725_v14, %v713_v13 }
 0x377   :  { %696 = vadd.xlane.f32.xlu1 %v695_v62  ;;  %v727_v19 = vadd.f32 %v726_v18, %v714_v15  ;;  %v778_v15 = vld [vmem:[%s3006_s7 + $0x10] sm:$0xff] }
 0x37f   :  { %701 = vadd.xlane.f32.xlu1 %v700_v12 }
 0x387   :  { %728 = vadd.xlane.f32.xlu1 %v727_v19 }
 0x3da   :  { %v692_v21 = vpop.xlane.xlu1 %691 }
 0x3db   :  { %v2409_v24 = vmul.f32 0.001953125, %v692_v21 }
 0x3dd   :  { %v736_v27 = vmul.f32 %v2409_v24, %v2409_v24 }
 0x3e2   :  { %v719_v26 = vpop.xlane.xlu1 %718 }
 0x3e3   :  { %v733_v32 = vmul.f32 0.001953125, %v719_v26 }
 0x3e4   :  { %v724_v60 = vpop.xlane.xlu2 %723 }
 0x3e5   :  { %v739_v55 = vsub.f32 %v733_v32, %v736_v27  ;;  %v734_v46 = vmul.f32 0.001953125, %v724_v60 }
 0x3e7   :  { %v742_v59 = vmax.f32 %v739_v55, 0.0 }
 0x3e9   :  { %v745_v20 = vadd.f32 1e-05, %v742_v59 }
 0x3ea   :  { %v697_v42 = vpop.xlane.xlu1 %696 }
 0x3eb   :  { %1957 = vrsqrt.f32 %v745_v20  ;;  %v2413_v45 = vmul.f32 0.001953125, %v697_v42  ;;  %vm754_vm1 = vweird.f32 %v745_v20 }
 0x3ed   :  { %v737_v47 = vmul.f32 %v2413_v45, %v2413_v45 }
 0x3ef   :  { %v740_v37 = vsub.f32 %v734_v46, %v737_v47 }
 0x3f1   :  { %v1958_v53 = vpop.eup %1957  ;;  %v743_v56 = vmax.f32 %v740_v37, 0.0  ;;  %v779_v37 = vld [vmem:[%s3006_s7 + $0x18] sm:$0xff] }
 0x3f2   :  { %v749_v57 = vmul.f32 %v1958_v53, %v745_v20  ;;  %v702_v62 = vpop.xlane.xlu1 %701  ;;  %vm755_vm15 = vweird.f32 %v1958_v53 }
 0x3f3   :  { %v746_v63 = vadd.f32 1e-05, %v743_v56  ;;  %v2417_v11 = vmul.f32 0.001953125, %v702_v62  ;;  %vm756_vm2 = vmor %vm754_vm1, %vm755_vm15 }
 0x3f4   :  { %v750_v3 = vmul.f32 %v1958_v53, %v749_v57 }
 0x3f5   :  { %1959 = vrsqrt.f32 %v746_v63  ;;  %v738_v19 = vmul.f32 %v2417_v11, %v2417_v11  ;;  %vm764_vm4 = vweird.f32 %v746_v63 }
 0x3f6   :  { %v751_v8 = vmul.f32 0.5, %v750_v3 }
 0x3f8   :  { %v752_v12 = vsub.f32 1.5, %v751_v8 }
 0x3fa   :  { %v729_v13 = vpop.xlane.xlu1 %728  ;;  %v753_v14 = vmul.f32 %v1958_v53, %v752_v12 }
 0x3fb   :  { %v1960_v18 = vpop.eup %1959  ;;  %v735_v21 = vmul.f32 0.001953125, %v729_v13 }
 0x3fc   :  { %v759_v26 = vmul.f32 %v1960_v18, %v746_v63  ;;  %v757_v27 = vsel %vm756_vm2, %v1958_v53, %v753_v14  ;;  %vm765_vm3 = vweird.f32 %v1960_v18  ;;  %v780_v63 = vld [vmem:[%s3006_s7 + $0x20] sm:$0xff] }
 0x3fd   :  { %v741_v32 = vsub.f32 %v735_v21, %v738_v19  ;;  %v781_v55 = vmul.f32 %v778_v15, %v757_v27  ;;  %vm766_vm5 = vmor %vm764_vm4, %vm765_vm3  ;;  %v846_v19 = vstv %s1889_s3  ;;  %v784_v21 = vsub.f32 %v2349_v16, %v2409_v24  ;;  %s1909_s3 = sld [smem:[#allocation5 + $0x7]] }
 0x3fe   :  { %v760_v59 = vmul.f32 %v1960_v18, %v759_v26  ;;  %v785_v26 = vsub.f32 %v2351_v17, %v2409_v24  ;;  %v786_v27 = vsub.f32 %v2359_v22, %v2409_v24  ;;  %v848_v22 = vmul.f32 %v846_v19, %v2146_v29 }
 0x3ff   :  { %v744_v60 = vmax.f32 %v741_v32, 0.0  ;;  %798 = vperm.xlu0 %1947, %v781_v55   ;;  %v787_v32 = vsub.f32 %v2361_v23, %v2409_v24  ;;  %v849_v23 = vmul.f32 %v846_v19, %v2148_v30  ;;  %v790_v29 = vsub.f32 %v2377_v43, %v2413_v45 }
 0x400   :  { %v761_v20 = vmul.f32 0.5, %v760_v59  ;;  %v791_v30 = vsub.f32 %v2379_v44, %v2413_v45 }
 0x401   :  { %v747_v42 = vadd.f32 1e-05, %v744_v60 }
 0x402   :  { %v762_v46 = vsub.f32 1.5, %v761_v20 }
 0x403   :  { %1961 = vrsqrt.f32 %v747_v42  ;;  %vm774_vm7 = vweird.f32 %v747_v42 }
 0x404   :  { %v763_v47 = vmul.f32 %v1960_v18, %v762_v46 }
 0x406   :  { %v767_v56 = vsel %vm766_vm5, %v1960_v18, %v763_v47  ;;  %v828_v18 = vstv %s1888_s26  ;;  %s1907_s26 = sld [smem:[#allocation5 + $0x5]]  ;;  %vm1326_vm5 = vcmask 326656  }
 0x407   :  { %v782_v57 = vmul.f32 %v779_v37, %v767_v56  ;;  %v829_v55 = vmul.f32 %v828_v18, %v2176_v48  ;;  %v830_v59 = vmul.f32 %v828_v18, %v2178_v49  ;;  %v831_v60 = vmul.f32 %v828_v18, %v2180_v50 }
 0x408   :  { %v832_v20 = vmul.f32 %v828_v18, %v2182_v51  ;;  %v847_v37 = vmul.f32 %v846_v19, %v2144_v28  ;;  %v850_v48 = vmul.f32 %v846_v19, %v2150_v31  ;;  %v789_v28 = vsub.f32 %v2369_v54, %v2413_v45 }
 0x409   :  { %v1962_v53 = vpop.eup %1961  ;;  %803 = vperm.xlu1 %1948, %v782_v57  }
 0x40a   :  { %v769_v62 = vmul.f32 %v1962_v53, %v747_v42  ;;  %vm775_vm6 = vweird.f32 %v1962_v53 }
 0x40b   :  { %vm776_vm8 = vmor %vm774_vm7, %vm775_vm6 }
 0x40c   :  { %v770_v3 = vmul.f32 %v1962_v53, %v769_v62 }
 0x40e   :  { %v771_v8 = vmul.f32 0.5, %v770_v3  ;;  %v864_v3 = vstv %s1890_s27  ;;  %s1910_s27 = sld [smem:[#allocation5 + $0x8]] }
 0x40f   :  { %v867_v18 = vmul.f32 %v864_v3, %v2284_v6  ;;  %v865_v19 = vmul.f32 %v864_v3, %v2280_v4 }
 0x410   :  { %v772_v12 = vsub.f32 1.5, %v771_v8  ;;  %v788_v8 = vsub.f32 %v2367_v41, %v2413_v45  ;;  %v868_v41 = vmul.f32 %v864_v3, %v2286_v0 }
 0x412   :  { %v773_v13 = vmul.f32 %v1962_v53, %v772_v12 }
 0x414   :  { %v777_v14 = vsel %vm776_vm8, %v1962_v53, %v773_v13 }
 0x415   :  { %v783_v15 = vmul.f32 %v780_v63, %v777_v14 }
 0x417   :  { %808 = vperm.xlu0 %1947, %v783_v15   ;;  %v866_v15 = vmul.f32 %v864_v3, %v2282_v5  ;;  %v906_v3 = vld [vmem:[%s3004_s5 + $0x8] sm:$0xff] }
 0x471   :  { %v799_v42 = vpop.permute.xlu0 %798 }
 0x472   :  { %v811_v16 = vmul.f32 %v799_v42, %v784_v21  ;;  %v812_v46 = vmul.f32 %v799_v42, %v785_v26  ;;  %v813_v47 = vmul.f32 %v799_v42, %v786_v27  ;;  %v814_v17 = vmul.f32 %v799_v42, %v787_v32 }
 0x474   :  { %v837_v24 = vadd.f32 %v829_v55, %v811_v16  ;;  %v838_v49 = vadd.f32 %v830_v59, %v812_v46  ;;  %v839_v56 = vadd.f32 %v831_v60, %v813_v47  ;;  %v840_v50 = vadd.f32 %v832_v20, %v814_v17 }
 0x475   :  { %v792_v55 = vsub.f32 %v2388_v58, %v2417_v11  ;;  %v793_v59 = vsub.f32 %v2390_v61, %v2417_v11  ;;  %v794_v60 = vsub.f32 %v2395_v2, %v2417_v11  ;;  %v795_v20 = vsub.f32 %v2398_v7, %v2417_v11 }
 0x476   :  { %v851_v57 = vadd.f32 %v847_v37, %v837_v24  ;;  %v852_v51 = vadd.f32 %v848_v22, %v838_v49  ;;  %v853_v53 = vadd.f32 %v849_v23, %v839_v56  ;;  %v854_v62 = vadd.f32 %v850_v48, %v840_v50  ;;  %v905_v24 = vld [vmem:[%s3004_s5] sm:$0xff] }
 0x47b   :  { %v804_v31 = vpop.permute.xlu1 %803 }
 0x47c   :  { %v815_v12 = vmul.f32 %v804_v31, %v788_v8  ;;  %v816_v13 = vmul.f32 %v804_v31, %v789_v28  ;;  %v817_v63 = vmul.f32 %v804_v31, %v790_v29  ;;  %v818_v14 = vmul.f32 %v804_v31, %v791_v30  ;;  %v907_v8 = vld [vmem:[%s3004_s5 + $0x10] sm:$0xff]  ;;  %v908_v28 = vld [vmem:[%s3004_s5 + $0x18] sm:$0xff] }
 0x47e   :  { %v855_v54 = vadd.f32 %v851_v57, %v815_v12  ;;  %v856_v21 = vadd.f32 %v852_v51, %v816_v13  ;;  %v857_v26 = vadd.f32 %v853_v53, %v817_v63  ;;  %v858_v43 = vadd.f32 %v854_v62, %v818_v14 }
 0x480   :  { %v869_v27 = vadd.f32 %v865_v19, %v855_v54  ;;  %v870_v32 = vadd.f32 %v866_v15, %v856_v21  ;;  %v871_v44 = vadd.f32 %v867_v18, %v857_v26  ;;  %v872_v45 = vadd.f32 %v868_v41, %v858_v43 }
 0x489   :  { %v809_v42 = vpop.permute.xlu0 %808 }
 0x48a   :  { %v819_v16 = vmul.f32 %v809_v42, %v792_v55  ;;  %v820_v46 = vmul.f32 %v809_v42, %v793_v59  ;;  %v821_v47 = vmul.f32 %v809_v42, %v794_v60  ;;  %v822_v17 = vmul.f32 %v809_v42, %v795_v20 }
 0x48c   :  { %v2466_v37 = vadd.f32 %v869_v27, %v819_v16  ;;  %v2468_v22 = vadd.f32 %v870_v32, %v820_v46  ;;  %v2470_v23 = vadd.f32 %v871_v44, %v821_v47  ;;  %v2472_v58 = vadd.f32 %v872_v45, %v822_v17 }
 0x48e   :  { %877 = vst [vmem:[#allocation4 + $0x38] sm:$0xff] %v2466_v37  ;;  %v3012_v61 = vmax.f32 %v2466_v37, 0.0  ;;  %v3011_v2 = vmax.f32 %v2468_v22, 0.0  ;;  %v3010_v7 = vmax.f32 %v2470_v23, 0.0  ;;  %v3009_v11 = vmax.f32 %v2472_v58, 0.0 }
 0x48f   :  { %878 = vst [vmem:[#allocation4 + $0x50] sm:$0xff] %v2468_v22 }
 0x490   :  { %879 = vst [vmem:[#allocation4 + $0x70] sm:$0xff] %v2470_v23  ;;  %933 = vmatpush.msrb.mxu0 %v3012_v61  ;;  %962 = vmatpush.msrb.mxu1 %v3011_v2 }
 0x491   :  { %880 = vst [vmem:[#allocation4 + $0xa0] sm:$0xff] %v2472_v58  ;;  %991 = vmatpush.msrb.mxu2 %v3010_v7  ;;  %1020 = vmatpush.msrb.mxu3 %v3009_v11 }
 0x492   :  { %934 = vmatpush.msrb.mxu0 %v2290_v1  ;;  %963 = vmatpush.msrb.mxu1 %v2293_v9 }
 0x493   :  { %992 = vmatpush.msrb.mxu2 %v2296_v10  ;;  %1021 = vmatpush.msrb.mxu3 %v2299_v25 }
 0x494   :  { %935 = vmatpush.msrb.mxu0 %v2154_v33  ;;  %964 = vmatpush.msrb.mxu1 %v2157_v38 }
 0x495   :  { %v1793_v48 = vld [vmem:[#allocation4 + $0x38] sm:$0xf]  ;;  %993 = vmatpush.msrb.mxu2 %v2160_v39  ;;  %1022 = vmatpush.msrb.mxu3 %v2163_v40 }
 0x496   :  { %v1794_v49 = vld [vmem:[#allocation4 + $0x50] sm:$0xf]  ;;  %v1797_v56 = vrot.slane %v1793_v48, 4  ;;  %936 = vmatpush.msrb.mxu0 %v2186_v52  ;;  %965 = vmatpush.msrb.mxu1 %v2189_v34 }
 0x497   :  { %v1798_v50 = vrot.slane %v1794_v49, 4  ;;  %v1822_v57 = vld [vmem:[#allocation4 + $0x70] sm:$0xf]  ;;  %994 = vmatpush.msrb.mxu2 %v2192_v35  ;;  %1023 = vmatpush.msrb.mxu3 %v2195_v36 }
 0x498   :  { %1801 = vst [vmem:[%s3008_s9] sm:$0xf0] %v1797_v56  ;;  %v1823_v51 = vld [vmem:[#allocation4 + $0xa0] sm:$0xf]  ;;  %v1826_v53 = vrot.slane %v1822_v57, 4  ;;  %1899 = vmatmul.msk.f32.vlgmr.msrb.gmra.mxu2 %vm113_vm0, %v905_v24  ;;  %1903 = vmatmul.msk.f32.vlgmr.msrb.gmra.mxu3 %vm113_vm0, %v905_v24 }
 0x499   :  { %1802 = vst [vmem:[%s3008_s9 + $0x8] sm:$0xf0] %v1798_v50  ;;  %v1827_v62 = vrot.slane %v1823_v51, 4  ;;  %1891 = vmatmul.msk.f32.vlgmr.msrb.gmra.mxu0 %vm113_vm0, %v905_v24  ;;  %1895 = vmatmul.msk.f32.vlgmr.msrb.gmra.mxu1 %vm113_vm0, %v905_v24 }
 0x49a   :  { %1938 = vst [vmem:[%s3008_s9 + $0x20] sm:$0xf0] %v1826_v53 }
 0x49b   :  { %1939 = vst [vmem:[%s3008_s9 + $0x28] sm:$0xf0] %v1827_v62 }
 0x4a0   :  { %1900 = vmatmul.msk.f32.gmra.mxu2 %vm113_vm0, %v906_v3  ;;  %1904 = vmatmul.msk.f32.gmra.mxu3 %vm113_vm0, %v906_v3 }
 0x4a1   :  { %1892 = vmatmul.msk.f32.gmra.mxu0 %vm113_vm0, %v906_v3  ;;  %1896 = vmatmul.msk.f32.gmra.mxu1 %vm113_vm0, %v906_v3 }
 0x4a8   :  { %1901 = vmatmul.msk.f32.gmra.mxu2 %vm113_vm0, %v907_v8  ;;  %1905 = vmatmul.msk.f32.gmra.mxu3 %vm113_vm0, %v907_v8 }
 0x4a9   :  { %1893 = vmatmul.msk.f32.gmra.mxu0 %vm113_vm0, %v907_v8  ;;  %1897 = vmatmul.msk.f32.gmra.mxu1 %vm113_vm0, %v907_v8 }
 0x4b0   :  { %1902 = vmatmul.msk.f32.gmra.mxu2 %vm113_vm0, %v908_v28  ;;  %1906 = vmatmul.msk.f32.gmra.mxu3 %vm113_vm0, %v908_v28 }
 0x4b1   :  { %1894 = vmatmul.msk.f32.gmra.mxu0 %vm113_vm0, %v908_v28  ;;  %1898 = vmatmul.msk.f32.gmra.mxu1 %vm113_vm0, %v908_v28 }
 0x516   :  { %v2542_v29 = vpop.f32.mrf.mxu0  ;;  %v2544_v30 = vpop.f32.mrf.mxu1 }
 0x517   :  { %v1057_v31 = vmul.f32 %v2542_v29, %v2542_v29  ;;  %v1058_v12 = vmul.f32 %v2544_v30, %v2544_v30  ;;  %v1037_v13 = vadd.f32 %v2544_v30, %v2542_v29 }
 0x519   :  { %v1073_v63 = vadd.f32 %v1058_v12, %v1057_v31 }
 0x51b   :  { %v2552_v14 = vpop.f32.mrf.mxu2  ;;  %v2554_v15 = vpop.f32.mrf.mxu3 }
 0x51c   :  { %v1059_v18 = vmul.f32 %v2552_v14, %v2552_v14  ;;  %v1038_v41 = vadd.f32 %v1037_v13, %v2552_v14  ;;  %v1060_v19 = vmul.f32 %v2554_v15, %v2554_v15 }
 0x51e   :  { %v1039_v54 = vadd.f32 %v1038_v41, %v2554_v15  ;;  %v2562_v21 = vpop.f32.mrf.mxu0  ;;  %v2564_v26 = vpop.f32.mrf.mxu1  ;;  %v1074_v43 = vadd.f32 %v1073_v63, %v1059_v18 }
 0x51f   :  { %v1061_v27 = vmul.f32 %v2562_v21, %v2562_v21  ;;  %v1062_v32 = vmul.f32 %v2564_v26, %v2564_v26  ;;  %v1042_v44 = vadd.f32 %v2564_v26, %v2562_v21 }
 0x520   :  { %1040 = vadd.xlane.f32.xlu0 %v1039_v54  ;;  %v1075_v45 = vadd.f32 %v1074_v43, %v1060_v19 }
 0x521   :  { %v1078_v55 = vadd.f32 %v1062_v32, %v1061_v27 }
 0x522   :  { %1076 = vadd.xlane.f32.xlu2 %v1075_v45 }
 0x523   :  { %v2572_v59 = vpop.f32.mrf.mxu2  ;;  %v2574_v60 = vpop.f32.mrf.mxu3 }
 0x524   :  { %v1063_v20 = vmul.f32 %v2572_v59, %v2572_v59  ;;  %v1043_v42 = vadd.f32 %v1042_v44, %v2572_v59  ;;  %v1064_v16 = vmul.f32 %v2574_v60, %v2574_v60 }
 0x526   :  { %v1044_v46 = vadd.f32 %v1043_v42, %v2574_v60  ;;  %v1079_v47 = vadd.f32 %v1078_v55, %v1063_v20  ;;  %v2582_v17 = vpop.f32.mrf.mxu0  ;;  %v2584_v48 = vpop.f32.mrf.mxu1 }
 0x527   :  { %v1047_v49 = vadd.f32 %v2584_v48, %v2582_v17  ;;  %v1065_v57 = vmul.f32 %v2582_v17, %v2582_v17  ;;  %v1066_v51 = vmul.f32 %v2584_v48, %v2584_v48 }
 0x528   :  { %1045 = vadd.xlane.f32.xlu1 %v1044_v46  ;;  %v1080_v24 = vadd.f32 %v1079_v47, %v1064_v16 }
 0x529   :  { %v1083_v8 = vadd.f32 %v1066_v51, %v1065_v57 }
 0x52a   :  { %1081 = vadd.xlane.f32.xlu2 %v1080_v24 }
 0x52b   :  { %v2588_v56 = vpop.f32.mrf.mxu2  ;;  %v2590_v50 = vpop.f32.mrf.mxu3 }
 0x52c   :  { %v1048_v53 = vadd.f32 %v1047_v49, %v2588_v56  ;;  %v1067_v3 = vmul.f32 %v2588_v56, %v2588_v56  ;;  %v1068_v12 = vmul.f32 %v2590_v50, %v2590_v50 }
 0x52e   :  { %v1049_v62 = vadd.f32 %v1048_v53, %v2590_v50  ;;  %v2600_v28 = vpop.f32.mrf.mxu0  ;;  %v2602_v31 = vpop.f32.mrf.mxu1  ;;  %v1084_v13 = vadd.f32 %v1083_v8, %v1067_v3 }
 0x52f   :  { %v1052_v63 = vadd.f32 %v2602_v31, %v2600_v28  ;;  %v1069_v43 = vmul.f32 %v2600_v28, %v2600_v28  ;;  %v1070_v27 = vmul.f32 %v2602_v31, %v2602_v31 }
 0x530   :  { %v1085_v41 = vadd.f32 %v1084_v13, %v1068_v12 }
 0x531   :  { %v1088_v45 = vadd.f32 %v1070_v27, %v1069_v43 }
 0x532   :  { %1050 = vadd.xlane.f32.xlu2 %v1049_v62 }
 0x533   :  { %v2608_v18 = vpop.f32.mrf.mxu2  ;;  %v2611_v54 = vpop.f32.mrf.mxu3 }
 0x534   :  { %v1053_v19 = vadd.f32 %v1052_v63, %v2608_v18  ;;  %v1071_v44 = vmul.f32 %v2608_v18, %v2608_v18  ;;  %v1072_v55 = vmul.f32 %v2611_v54, %v2611_v54 }
 0x536   :  { %v1054_v32 = vadd.f32 %v1053_v19, %v2611_v54  ;;  %v1089_v20 = vadd.f32 %v1088_v45, %v1071_v44 }
 0x538   :  { %v1090_v42 = vadd.f32 %v1089_v20, %v1072_v55 }
 0x53a   :  { %1086 = vadd.xlane.f32.xlu2 %v1085_v41 }
 0x542   :  { %1055 = vadd.xlane.f32.xlu2 %v1054_v32 }
 0x54a   :  { %1091 = vadd.xlane.f32.xlu2 %v1090_v42 }
 0x593   :  { %v1041_v16 = vpop.xlane.xlu0 %1040 }
 0x594   :  { %v2622_v46 = vmul.f32 0.001953125, %v1041_v16 }
 0x595   :  { %v1077_v47 = vpop.xlane.xlu2 %1076 }
 0x596   :  { %v1097_v24 = vmul.f32 0.001953125, %v1077_v47  ;;  %v1101_v49 = vmul.f32 %v2622_v46, %v2622_v46 }
 0x598   :  { %v1105_v57 = vsub.f32 %v1097_v24, %v1101_v49  ;;  %v1157_v49 = vld [vmem:[%s3006_s7 + $0x28] sm:$0xff] }
 0x59a   :  { %v1109_v51 = vmax.f32 %v1105_v57, 0.0 }
 0x59b   :  { %v1046_v53 = vpop.xlane.xlu1 %1045 }
 0x59c   :  { %v1113_v62 = vadd.f32 1e-05, %v1109_v51  ;;  %v2626_v3 = vmul.f32 0.001953125, %v1046_v53 }
 0x59d   :  { %v1082_v8 = vpop.xlane.xlu2 %1081 }
 0x59e   :  { %1963 = vrsqrt.f32 %v1113_v62  ;;  %v1098_v12 = vmul.f32 0.001953125, %v1082_v8  ;;  %v1102_v13 = vmul.f32 %v2626_v3, %v2626_v3  ;;  %vm1123_vm9 = vweird.f32 %v1113_v62 }
 0x5a0   :  { %v1106_v63 = vsub.f32 %v1098_v12, %v1102_v13 }
 0x5a2   :  { %v1110_v41 = vmax.f32 %v1106_v63, 0.0 }
 0x5a4   :  { %v1964_v19 = vpop.eup %1963  ;;  %v1114_v43 = vadd.f32 1e-05, %v1110_v41 }
 0x5a5   :  { %v1118_v27 = vmul.f32 %v1964_v19, %v1113_v62  ;;  %v1051_v32 = vpop.xlane.xlu2 %1050  ;;  %vm1124_vm0 = vweird.f32 %v1964_v19 }
 0x5a6   :  { %1965 = vrsqrt.f32 %v1114_v43  ;;  %v2630_v55 = vmul.f32 0.001953125, %v1051_v32  ;;  %vm1125_vm10 = vmor %vm1123_vm9, %vm1124_vm0  ;;  %vm1133_vm12 = vweird.f32 %v1114_v43 }
 0x5a7   :  { %v1119_v44 = vmul.f32 %v1964_v19, %v1118_v27 }
 0x5a8   :  { %v1103_v57 = vmul.f32 %v2630_v55, %v2630_v55 }
 0x5a9   :  { %v1120_v45 = vmul.f32 0.5, %v1119_v44 }
 0x5ab   :  { %v1121_v20 = vsub.f32 1.5, %v1120_v45  ;;  %v1158_v45 = vld [vmem:[%s3006_s7 + $0x30] sm:$0xff] }
 0x5ac   :  { %v1966_v42 = vpop.eup %1965 }
 0x5ad   :  { %v1128_v16 = vmul.f32 %v1966_v42, %v1114_v43  ;;  %v1087_v47 = vpop.xlane.xlu2 %1086  ;;  %v1122_v24 = vmul.f32 %v1964_v19, %v1121_v20  ;;  %vm1134_vm11 = vweird.f32 %v1966_v42 }
 0x5ae   :  { %v1099_v51 = vmul.f32 0.001953125, %v1087_v47  ;;  %vm1135_vm13 = vmor %vm1133_vm12, %vm1134_vm11 }
 0x5af   :  { %v1129_v53 = vmul.f32 %v1966_v42, %v1128_v16  ;;  %v1126_v8 = vsel %vm1125_vm10, %v1964_v19, %v1122_v24 }
 0x5b0   :  { %v1107_v12 = vsub.f32 %v1099_v51, %v1103_v57  ;;  %v1161_v13 = vmul.f32 %v1157_v49, %v1126_v8 }
 0x5b1   :  { %v1130_v63 = vmul.f32 0.5, %v1129_v53 }
 0x5b2   :  { %v1111_v41 = vmax.f32 %v1107_v12, 0.0  ;;  %1183 = vperm.xlu0 %1947, %v1161_v13  }
 0x5b3   :  { %v1131_v62 = vsub.f32 1.5, %v1130_v63 }
 0x5b4   :  { %v1115_v27 = vadd.f32 1e-05, %v1111_v41  ;;  %v1159_v41 = vld [vmem:[%s3006_s7 + $0x38] sm:$0xff] }
 0x5b5   :  { %v1056_v32 = vpop.xlane.xlu2 %1055  ;;  %v1132_v44 = vmul.f32 %v1966_v42, %v1131_v62 }
 0x5b6   :  { %1967 = vrsqrt.f32 %v1115_v27  ;;  %v2640_v19 = vmul.f32 0.001953125, %v1056_v32  ;;  %vm1143_vm15 = vweird.f32 %v1115_v27 }
 0x5b7   :  { %v1136_v20 = vsel %vm1135_vm13, %v1966_v42, %v1132_v44 }
 0x5b8   :  { %v1162_v16 = vmul.f32 %v1158_v45, %v1136_v20  ;;  %v1104_v57 = vmul.f32 %v2640_v19, %v2640_v19 }
 0x5ba   :  { %1188 = vperm.xlu2 %1946, %v1162_v16  }
 0x5bc   :  { %v1968_v47 = vpop.eup %1967 }
 0x5bd   :  { %v1138_v24 = vmul.f32 %v1968_v47, %v1115_v27  ;;  %v1092_v49 = vpop.xlane.xlu2 %1091  ;;  %vm1144_vm14 = vweird.f32 %v1968_v47  ;;  %v1160_v27 = vld [vmem:[%s3006_s7 + $0x40] sm:$0xff] }
 0x5be   :  { %v1100_v43 = vmul.f32 0.001953125, %v1092_v49  ;;  %vm1145_vm1 = vmor %vm1143_vm15, %vm1144_vm14 }
 0x5bf   :  { %v1139_v51 = vmul.f32 %v1968_v47, %v1138_v24 }
 0x5c0   :  { %v1108_v53 = vsub.f32 %v1100_v43, %v1104_v57 }
 0x5c1   :  { %v1140_v8 = vmul.f32 0.5, %v1139_v51  ;;  %v2652_v51 = vld [vmem:[#allocation4 + $0x28] sm:$0xff] }
 0x5c2   :  { %v1112_v12 = vmax.f32 %v1108_v53, 0.0  ;;  %3024 = vst [vmem:[#allocation10_spill] sm:$0xff] %v2652_v51  ;;  %v1240_v53 = vstv %s1908_s25 }
 0x5c3   :  { %v1141_v13 = vsub.f32 1.5, %v1140_v8  ;;  %v2654_v8 = vld [vmem:[#allocation4 + $0xb0] sm:$0xff] }
 0x5c4   :  { %v1116_v63 = vadd.f32 1e-05, %v1112_v12  ;;  %3025 = vst [vmem:[#allocation11_spill] sm:$0xff] %v2654_v8  ;;  %v1222_v12 = vstv %s1907_s26 }
 0x5c5   :  { %v1142_v42 = vmul.f32 %v1968_v47, %v1141_v13  ;;  %v2656_v13 = vld [vmem:[#allocation4 + $0x40] sm:$0xff] }
 0x5c6   :  { %1969 = vrsqrt.f32 %v1116_v63  ;;  %vm1153_vm3 = vweird.f32 %v1116_v63  ;;  %3026 = vst [vmem:[#allocation12_spill] sm:$0xff] %v2656_v13 }
 0x5c7   :  { %v1146_v62 = vsel %vm1145_vm1, %v1968_v47, %v1142_v42  ;;  %v2650_v47 = vld [vmem:[#allocation4 + $0x60] sm:$0xff] }
 0x5c8   :  { %v1163_v32 = vmul.f32 %v1159_v41, %v1146_v62  ;;  %3023 = vst [vmem:[#allocation9_spill] sm:$0xff] %v2650_v47  ;;  %v2660_v42 = vld [vmem:[#allocation4] sm:$0xff]  ;;  %v2662_v41 = vld [vmem:[#allocation4 + $0x10] sm:$0xff]  ;;  %v2664_v62 = vld [vmem:[#allocation4 + $0x48] sm:$0xff] }
 0x5c9   :  { %3028 = vst [vmem:[#allocation14_spill] sm:$0xff] %v2660_v42  ;;  %v1225_v11 = vmul.f32 %v1222_v12, %v2662_v41  ;;  %v1226_v7 = vmul.f32 %v1222_v12, %v2664_v62 }
 0x5ca   :  { %1193 = vperm.xlu1 %1948, %v1163_v32   ;;  %3029 = vst [vmem:[#allocation15_spill] sm:$0xff] %v2662_v41  ;;  %v1241_v32 = vmul.f32 %v1240_v53, %v2650_v47 }
 0x5cb   :  { %3030 = vst [vmem:[#allocation16_spill] sm:$0xff] %v2664_v62 }
 0x5cc   :  { %v1970_v44 = vpop.eup %1969 }
 0x5cd   :  { %v1148_v45 = vmul.f32 %v1970_v44, %v1116_v63  ;;  %vm1154_vm2 = vweird.f32 %v1970_v44  ;;  %v2658_v63 = vld [vmem:[#allocation4 + $0x78] sm:$0xff] }
 0x5ce   :  { %vm1155_vm4 = vmor %vm1153_vm3, %vm1154_vm2  ;;  %3027 = vst [vmem:[#allocation13_spill] sm:$0xff] %v2658_v63 }
 0x5cf   :  { %v1149_v20 = vmul.f32 %v1970_v44, %v1148_v45  ;;  %v1242_v45 = vmul.f32 %v1240_v53, %v2652_v51 }
 0x5d1   :  { %v1150_v16 = vmul.f32 0.5, %v1149_v20  ;;  %v1243_v20 = vmul.f32 %v1240_v53, %v2656_v13 }
 0x5d3   :  { %v1151_v24 = vsub.f32 1.5, %v1150_v16  ;;  %v1244_v16 = vmul.f32 %v1240_v53, %v2658_v63  ;;  %v1258_v53 = vstv %s1909_s3 }
 0x5d4   :  { %v1260_v36 = vmul.f32 %v1258_v53, %v2282_v5  ;;  %v1175_v5 = vsub.f32 %v2588_v56, %v2630_v55 }
 0x5d5   :  { %v1152_v49 = vmul.f32 %v1970_v44, %v1151_v24  ;;  %v1165_v24 = vsub.f32 %v2542_v29, %v2622_v46 }
 0x5d7   :  { %v1156_v57 = vsel %vm1155_vm4, %v1970_v44, %v1152_v49  ;;  %v1223_v44 = vmul.f32 %v1222_v12, %v2654_v8  ;;  %v1166_v49 = vsub.f32 %v2544_v30, %v2622_v46  ;;  %v1169_v30 = vsub.f32 %v2562_v21, %v2626_v3 }
 0x5d8   :  { %v1164_v43 = vmul.f32 %v1160_v27, %v1156_v57  ;;  %v1167_v27 = vsub.f32 %v2552_v14, %v2622_v46  ;;  %v1168_v57 = vsub.f32 %v2554_v15, %v2622_v46  ;;  %v1170_v14 = vsub.f32 %v2564_v26, %v2626_v3 }
 0x5d9   :  { %v1171_v15 = vsub.f32 %v2572_v59, %v2626_v3  ;;  %v1172_v46 = vsub.f32 %v2574_v60, %v2626_v3  ;;  %v1259_v26 = vmul.f32 %v1258_v53, %v2280_v4  ;;  %v1261_v59 = vmul.f32 %v1258_v53, %v2284_v6 }
 0x5da   :  { %1198 = vperm.xlu0 %1947, %v1164_v43   ;;  %v1224_v43 = vmul.f32 %v1222_v12, %v2660_v42  ;;  %v1262_v60 = vmul.f32 %v1258_v53, %v2286_v0  ;;  %v1174_v4 = vsub.f32 %v2584_v48, %v2630_v55  ;;  %v1176_v6 = vsub.f32 %v2590_v50, %v2630_v55 }
 0x614   :  { %v1189_v61 = vpop.permute.xlu2 %1188 }
 0x624   :  { %v1184_v2 = vpop.permute.xlu0 %1183 }
 0x625   :  { %v1201_v63 = vmul.f32 %v1184_v2, %v1165_v24  ;;  %v1202_v29 = vmul.f32 %v1184_v2, %v1166_v49  ;;  %v1203_v13 = vmul.f32 %v1184_v2, %v1167_v27  ;;  %v1204_v51 = vmul.f32 %v1184_v2, %v1168_v57 }
 0x626   :  { %v1205_v24 = vmul.f32 %v1189_v61, %v1169_v30  ;;  %v1206_v49 = vmul.f32 %v1189_v61, %v1170_v14  ;;  %v1207_v27 = vmul.f32 %v1189_v61, %v1171_v15  ;;  %v1208_v2 = vmul.f32 %v1189_v61, %v1172_v46 }
 0x627   :  { %v1231_v12 = vadd.f32 %v1223_v44, %v1201_v63  ;;  %v1232_v47 = vadd.f32 %v1224_v43, %v1202_v29  ;;  %v1233_v62 = vadd.f32 %v1225_v11, %v1203_v13  ;;  %v1234_v41 = vadd.f32 %v1226_v7, %v1204_v51 }
 0x628   :  { %v1177_v30 = vsub.f32 %v2600_v28, %v2640_v19  ;;  %v1178_v14 = vsub.f32 %v2602_v31, %v2640_v19  ;;  %v1179_v15 = vsub.f32 %v2608_v18, %v2640_v19  ;;  %v1180_v46 = vsub.f32 %v2611_v54, %v2640_v19 }
 0x629   :  { %v1245_v57 = vadd.f32 %v1241_v32, %v1231_v12  ;;  %v1246_v42 = vadd.f32 %v1242_v45, %v1232_v47  ;;  %v1247_v21 = vadd.f32 %v1243_v20, %v1233_v62  ;;  %v1248_v8 = vadd.f32 %v1244_v16, %v1234_v41 }
 0x62a   :  { %v1276_v47 = vstv %s1910_s27  ;;  %v1173_v41 = vsub.f32 %v2582_v17, %v2630_v55  ;;  %s1931_s27 = sld [smem:[#allocation5 + $0x9]] }
 0x62b   :  { %v1249_v3 = vadd.f32 %v1245_v57, %v1205_v24  ;;  %v1250_v63 = vadd.f32 %v1246_v42, %v1206_v49  ;;  %v1251_v11 = vadd.f32 %v1247_v21, %v1207_v27  ;;  %v1252_v7 = vadd.f32 %v1248_v8, %v1208_v2 }
 0x62c   :  { %v1278_v32 = vmul.f32 %v1276_v47, %v2468_v22  ;;  %v1279_v45 = vmul.f32 %v1276_v47, %v2470_v23  ;;  %v1280_v17 = vmul.f32 %v1276_v47, %v2472_v58  ;;  %v1277_v20 = vmul.f32 %v1276_v47, %v2466_v37 }
 0x62d   :  { %v1263_v51 = vadd.f32 %v1259_v26, %v1249_v3  ;;  %v1264_v13 = vadd.f32 %v1260_v36, %v1250_v63  ;;  %v1265_v44 = vadd.f32 %v1261_v59, %v1251_v11  ;;  %v1266_v61 = vadd.f32 %v1262_v60, %v1252_v7 }
 0x62e   :  { %v3031_v59 = vmax.f32 %v2466_v37, 0.0  ;;  %v3032_v60 = vmax.f32 %v2468_v22, 0.0  ;;  %v3033_v3 = vmax.f32 %v2470_v23, 0.0  ;;  %v3034_v63 = vmax.f32 %v2472_v58, 0.0 }
 0x63c   :  { %v1194_v0 = vpop.permute.xlu1 %1193 }
 0x63d   :  { %v1209_v8 = vmul.f32 %v1194_v0, %v1173_v41  ;;  %v1210_v42 = vmul.f32 %v1194_v0, %v1174_v4  ;;  %v1211_v36 = vmul.f32 %v1194_v0, %v1175_v5  ;;  %v1212_v62 = vmul.f32 %v1194_v0, %v1176_v6 }
 0x63f   :  { %v1267_v48 = vadd.f32 %v1263_v51, %v1209_v8  ;;  %v1268_v16 = vadd.f32 %v1264_v13, %v1210_v42  ;;  %v1269_v43 = vadd.f32 %v1265_v44, %v1211_v36  ;;  %v1270_v56 = vadd.f32 %v1266_v61, %v1212_v62 }
 0x641   :  { %v1281_v53 = vadd.f32 %v1277_v20, %v1267_v48  ;;  %v1282_v29 = vadd.f32 %v1278_v32, %v1268_v16  ;;  %v1283_v50 = vadd.f32 %v1279_v45, %v1269_v43  ;;  %v1284_v55 = vadd.f32 %v1280_v17, %v1270_v56 }
 0x64c   :  { %v1199_v12 = vpop.permute.xlu0 %1198 }
 0x64d   :  { %v1213_v24 = vmul.f32 %v1199_v12, %v1177_v30  ;;  %v1214_v49 = vmul.f32 %v1199_v12, %v1178_v14  ;;  %v1215_v27 = vmul.f32 %v1199_v12, %v1179_v15  ;;  %v1216_v2 = vmul.f32 %v1199_v12, %v1180_v46 }
 0x64f   :  { %v2714_v57 = vadd.f32 %v1281_v53, %v1213_v24  ;;  %v2716_v21 = vadd.f32 %v1282_v29, %v1214_v49  ;;  %v2718_v26 = vadd.f32 %v1283_v50, %v1215_v27  ;;  %v2720_v28 = vadd.f32 %v1284_v55, %v1216_v2 }
 0x651   :  { %1289 = vst [vmem:[#allocation4 + $0xa8] sm:$0xff] %v2714_v57  ;;  %v1293_v31 = vmax.f32 %v2714_v57, 0.0  ;;  %v1294_v18 = vmax.f32 %v2716_v21, 0.0  ;;  %v1295_v54 = vmax.f32 %v2718_v26, 0.0  ;;  %v1296_v19 = vmax.f32 %v2720_v28, 0.0 }
 0x652   :  { %1290 = vst [vmem:[#allocation4 + $0x68] sm:$0xff] %v2716_v21 }
 0x653   :  { %1291 = vst [vmem:[#allocation4 + $0x30] sm:$0xff] %v2718_v26  ;;  %1353 = vmatpush.msra.mxu0 %v1293_v31  ;;  %1385 = vmatpush.msra.mxu1 %v1294_v18 }
 0x654   :  { %1292 = vst [vmem:[#allocation4 + $0x58] sm:$0xff] %v2720_v28  ;;  %1417 = vmatpush.msra.mxu2 %v1295_v54  ;;  %1449 = vmatpush.msra.mxu3 %v1296_v19 }
 0x655   :  { %1354 = vmatpush.msra.mxu0 %v3031_v59  ;;  %1386 = vmatpush.msra.mxu1 %v3032_v60 }
 0x656   :  { %1418 = vmatpush.msra.mxu2 %v3033_v3  ;;  %1450 = vmatpush.msra.mxu3 %v3034_v63 }
 0x657   :  { %1355 = vmatpush.msra.mxu0 %v2290_v1  ;;  %1387 = vmatpush.msra.mxu1 %v2293_v9  ;;  %v1321_v9 = vld [vmem:[%s3005_s6] sm:$0xff] }
 0x658   :  { %v1803_v11 = vld [vmem:[#allocation4 + $0xa8] sm:$0xf]  ;;  %1419 = vmatpush.msra.mxu2 %v2296_v10  ;;  %1451 = vmatpush.msra.mxu3 %v2299_v25 }
 0x659   :  { %v1804_v37 = vld [vmem:[#allocation4 + $0x68] sm:$0xf]  ;;  %1805 = vst [vmem:[%s3008_s9 + $0x10] sm:$0xf] %v1803_v11  ;;  %1356 = vmatpush.msra.mxu0 %v2154_v33  ;;  %1388 = vmatpush.msra.mxu1 %v2157_v38  ;;  %v3035_v33 = vld [vmem:[#allocation8_spill] sm:$0xff] }
 0x65a   :  { %1806 = vst [vmem:[%s3008_s9 + $0x18] sm:$0xf] %v1804_v37  ;;  %v1832_v1 = vld [vmem:[#allocation4 + $0x30] sm:$0xf]  ;;  %1420 = vmatpush.msra.mxu2 %v2160_v39  ;;  %1452 = vmatpush.msra.mxu3 %v2163_v40  ;;  %v1322_v38 = vld [vmem:[%s3005_s6 + $0x8] sm:$0xff]  ;;  %v1324_v40 = vld [vmem:[%s3005_s6 + $0x18] sm:$0xff] }
 0x65b   :  { %v1833_v10 = vld [vmem:[#allocation4 + $0x58] sm:$0xf]  ;;  %1940 = vst [vmem:[%s3008_s9 + $0x30] sm:$0xf] %v1832_v1  ;;  %1357 = vmatpush.msra.mxu0 %v2186_v52  ;;  %1389 = vmatpush.msra.mxu1 %v2189_v34  ;;  %v1323_v39 = vld [vmem:[%s3005_s6 + $0x10] sm:$0xff]  ;;  %v1325_v52 = vld [vmem:[%s3005_s6 + $0x20] sm:$0xff] }
 0x65c   :  { %1941 = vst [vmem:[%s3008_s9 + $0x38] sm:$0xf] %v1833_v10  ;;  %1421 = vmatpush.msra.mxu2 %v2192_v35  ;;  %1453 = vmatpush.msra.mxu3 %v3035_v33 }
 0x65d   :  { %1921 = vmatmul.msk.f32.vlgmr.msra.gmra.mxu2 %vm1326_vm5, %v1321_v9  ;;  %1926 = vmatmul.msk.f32.vlgmr.msra.gmra.mxu3 %vm1326_vm5, %v1321_v9 }
 0x65e   :  { %1911 = vmatmul.msk.f32.vlgmr.msra.gmra.mxu0 %vm1326_vm5, %v1321_v9  ;;  %1916 = vmatmul.msk.f32.vlgmr.msra.gmra.mxu1 %vm1326_vm5, %v1321_v9 }
 0x665   :  { %1922 = vmatmul.msk.f32.gmra.mxu2 %vm1326_vm5, %v1322_v38  ;;  %1927 = vmatmul.msk.f32.gmra.mxu3 %vm1326_vm5, %v1322_v38 }
 0x666   :  { %1912 = vmatmul.msk.f32.gmra.mxu0 %vm1326_vm5, %v1322_v38  ;;  %1917 = vmatmul.msk.f32.gmra.mxu1 %vm1326_vm5, %v1322_v38 }
 0x66d   :  { %1923 = vmatmul.msk.f32.gmra.mxu2 %vm1326_vm5, %v1323_v39  ;;  %1928 = vmatmul.msk.f32.gmra.mxu3 %vm1326_vm5, %v1323_v39 }
 0x66e   :  { %1913 = vmatmul.msk.f32.gmra.mxu0 %vm1326_vm5, %v1323_v39  ;;  %1918 = vmatmul.msk.f32.gmra.mxu1 %vm1326_vm5, %v1323_v39 }
 0x675   :  { %1924 = vmatmul.msk.f32.gmra.mxu2 %vm1326_vm5, %v1324_v40  ;;  %1929 = vmatmul.msk.f32.gmra.mxu3 %vm1326_vm5, %v1324_v40 }
 0x676   :  { %1914 = vmatmul.msk.f32.gmra.mxu0 %vm1326_vm5, %v1324_v40  ;;  %1919 = vmatmul.msk.f32.gmra.mxu1 %vm1326_vm5, %v1324_v40 }
 0x67d   :  { %1925 = vmatmul.msk.f32.gmra.mxu2 %vm1326_vm5, %v1325_v52  ;;  %1930 = vmatmul.msk.f32.gmra.mxu3 %vm1326_vm5, %v1325_v52 }
 0x67e   :  { %1915 = vmatmul.msk.f32.gmra.mxu0 %vm1326_vm5, %v1325_v52  ;;  %1920 = vmatmul.msk.f32.gmra.mxu1 %vm1326_vm5, %v1325_v52 }
 0x6db   :  { %v2797_v34 = vpop.f32.mrf.mxu0  ;;  %v2799_v35 = vpop.f32.mrf.mxu1 }
 0x6dc   :  { %v1495_v25 = vmul.f32 %v2797_v34, %v2797_v34  ;;  %v1496_v22 = vmul.f32 %v2799_v35, %v2799_v35  ;;  %v1470_v23 = vadd.f32 %v2799_v35, %v2797_v34 }
 0x6de   :  { %v1515_v58 = vadd.f32 %v1496_v22, %v1495_v25 }
 0x6e0   :  { %v2807_v7 = vpop.f32.mrf.mxu2  ;;  %v2809_v51 = vpop.f32.mrf.mxu3 }
 0x6e1   :  { %v1497_v13 = vmul.f32 %v2807_v7, %v2807_v7  ;;  %v1471_v44 = vadd.f32 %v1470_v23, %v2807_v7  ;;  %v1498_v61 = vmul.f32 %v2809_v51, %v2809_v51 }
 0x6e3   :  { %v1472_v47 = vadd.f32 %v1471_v44, %v2809_v51  ;;  %v2817_v41 = vpop.f32.mrf.mxu0  ;;  %v2819_v4 = vpop.f32.mrf.mxu1  ;;  %v1516_v5 = vadd.f32 %v1515_v58, %v1497_v13 }
 0x6e4   :  { %v1499_v6 = vmul.f32 %v2817_v41, %v2817_v41  ;;  %v1500_v0 = vmul.f32 %v2819_v4, %v2819_v4  ;;  %v1475_v8 = vadd.f32 %v2819_v4, %v2817_v41 }
 0x6e5   :  { %1473 = vadd.xlane.f32.xlu0 %v1472_v47  ;;  %v1517_v42 = vadd.f32 %v1516_v5, %v1498_v61 }
 0x6e6   :  { %v1520_v36 = vadd.f32 %v1500_v0, %v1499_v6 }
 0x6e7   :  { %1518 = vadd.xlane.f32.xlu2 %v1517_v42 }
 0x6e8   :  { %v2827_v62 = vpop.f32.mrf.mxu2  ;;  %v2829_v32 = vpop.f32.mrf.mxu3 }
 0x6e9   :  { %v1501_v45 = vmul.f32 %v2827_v62, %v2827_v62  ;;  %v1476_v17 = vadd.f32 %v1475_v8, %v2827_v62  ;;  %v1502_v20 = vmul.f32 %v2829_v32, %v2829_v32 }
 0x6eb   :  { %v1477_v48 = vadd.f32 %v1476_v17, %v2829_v32  ;;  %v2837_v16 = vpop.f32.mrf.mxu0  ;;  %v2839_v43 = vpop.f32.mrf.mxu1  ;;  %v1521_v56 = vadd.f32 %v1520_v36, %v1501_v45 }
 0x6ec   :  { %v1503_v53 = vmul.f32 %v2837_v16, %v2837_v16  ;;  %v1504_v29 = vmul.f32 %v2839_v43, %v2839_v43  ;;  %v1480_v50 = vadd.f32 %v2839_v43, %v2837_v16 }
 0x6ed   :  { %1478 = vadd.xlane.f32.xlu1 %v1477_v48  ;;  %v1522_v55 = vadd.f32 %v1521_v56, %v1502_v20 }
 0x6ee   :  { %v1525_v30 = vadd.f32 %v1504_v29, %v1503_v53 }
 0x6ef   :  { %1523 = vadd.xlane.f32.xlu0 %v1522_v55 }
 0x6f0   :  { %v2847_v14 = vpop.f32.mrf.mxu2  ;;  %v2849_v15 = vpop.f32.mrf.mxu3 }
 0x6f1   :  { %v1505_v46 = vmul.f32 %v2847_v14, %v2847_v14  ;;  %v1481_v12 = vadd.f32 %v1480_v50, %v2847_v14  ;;  %v1506_v24 = vmul.f32 %v2849_v15, %v2849_v15 }
 0x6f3   :  { %v1482_v49 = vadd.f32 %v1481_v12, %v2849_v15  ;;  %v2857_v27 = vpop.f32.mrf.mxu0  ;;  %v2859_v2 = vpop.f32.mrf.mxu1  ;;  %v1526_v31 = vadd.f32 %v1525_v30, %v1505_v46 }
 0x6f4   :  { %v1507_v18 = vmul.f32 %v2857_v27, %v2857_v27  ;;  %v1508_v54 = vmul.f32 %v2859_v2, %v2859_v2  ;;  %v1485_v19 = vadd.f32 %v2859_v2, %v2857_v27 }
 0x6f5   :  { %1483 = vadd.xlane.f32.xlu2 %v1482_v49  ;;  %v1527_v59 = vadd.f32 %v1526_v31, %v1506_v24 }
 0x6f6   :  { %v1530_v60 = vadd.f32 %v1508_v54, %v1507_v18 }
 0x6f7   :  { %1528 = vadd.xlane.f32.xlu1 %v1527_v59 }
 0x6f8   :  { %v2867_v3 = vpop.f32.mrf.mxu2  ;;  %v2869_v63 = vpop.f32.mrf.mxu3 }
 0x6f9   :  { %v1509_v11 = vmul.f32 %v2867_v3, %v2867_v3  ;;  %v1486_v37 = vadd.f32 %v1485_v19, %v2867_v3  ;;  %v1510_v1 = vmul.f32 %v2869_v63, %v2869_v63 }
 0x6fb   :  { %v1487_v9 = vadd.f32 %v1486_v37, %v2869_v63  ;;  %v2877_v10 = vpop.f32.mrf.mxu0  ;;  %v2879_v33 = vpop.f32.mrf.mxu1  ;;  %v1531_v38 = vadd.f32 %v1530_v60, %v1509_v11 }
 0x6fc   :  { %v1511_v39 = vmul.f32 %v2877_v10, %v2877_v10  ;;  %v1512_v40 = vmul.f32 %v2879_v33, %v2879_v33  ;;  %v1490_v52 = vadd.f32 %v2879_v33, %v2877_v10 }
 0x6fd   :  { %1488 = vadd.xlane.f32.xlu0 %v1487_v9  ;;  %v1532_v25 = vadd.f32 %v1531_v38, %v1510_v1 }
 0x6fe   :  { %v1535_v22 = vadd.f32 %v1512_v40, %v1511_v39 }
 0x6ff   :  { %1533 = vadd.xlane.f32.xlu2 %v1532_v25 }
 0x700   :  { %v2887_v23 = vpop.f32.mrf.mxu2  ;;  %v2889_v58 = vpop.f32.mrf.mxu3 }
 0x701   :  { %v1491_v13 = vadd.f32 %v1490_v52, %v2887_v23  ;;  %v1513_v44 = vmul.f32 %v2887_v23, %v2887_v23  ;;  %v1514_v61 = vmul.f32 %v2889_v58, %v2889_v58 }
 0x703   :  { %v1492_v47 = vadd.f32 %v1491_v13, %v2889_v58  ;;  %v1536_v5 = vadd.f32 %v1535_v22, %v1513_v44  ;;  %v1620_v44 = vld [vmem:[%s3006_s7 + $0x48] sm:$0xff] }
 0x705   :  { %1493 = vadd.xlane.f32.xlu1 %v1492_v47  ;;  %v1537_v6 = vadd.f32 %v1536_v5, %v1514_v61 }
 0x707   :  { %1538 = vadd.xlane.f32.xlu0 %v1537_v6 }
 0x758   :  { %v1474_v0 = vpop.xlane.xlu0 %1473 }
 0x759   :  { %v2897_v8 = vmul.f32 0.001953125, %v1474_v0 }
 0x75a   :  { %v1519_v42 = vpop.xlane.xlu2 %1518 }
 0x75b   :  { %v1545_v36 = vmul.f32 0.001953125, %v1519_v42  ;;  %v1550_v45 = vmul.f32 %v2897_v8, %v2897_v8 }
 0x75d   :  { %v1555_v17 = vsub.f32 %v1545_v36, %v1550_v45 }
 0x75f   :  { %v1560_v20 = vmax.f32 %v1555_v17, 0.0 }
 0x760   :  { %v1479_v48 = vpop.xlane.xlu1 %1478 }
 0x761   :  { %v1565_v56 = vadd.f32 1e-05, %v1560_v20  ;;  %v2901_v53 = vmul.f32 0.001953125, %v1479_v48 }
 0x762   :  { %v1524_v29 = vpop.xlane.xlu0 %1523 }
 0x763   :  { %1971 = vrsqrt.f32 %v1565_v56  ;;  %v1546_v50 = vmul.f32 0.001953125, %v1524_v29  ;;  %v1551_v55 = vmul.f32 %v2901_v53, %v2901_v53  ;;  %vm1576_vm7 = vweird.f32 %v1565_v56 }
 0x765   :  { %v1556_v30 = vsub.f32 %v1546_v50, %v1551_v55 }
 0x767   :  { %v1561_v46 = vmax.f32 %v1556_v30, 0.0 }
 0x768   :  { %v1484_v12 = vpop.xlane.xlu2 %1483 }
 0x769   :  { %v1972_v24 = vpop.eup %1971  ;;  %v1566_v49 = vadd.f32 1e-05, %v1561_v46  ;;  %v2905_v31 = vmul.f32 0.001953125, %v1484_v12  ;;  %v1621_v46 = vld [vmem:[%s3006_s7 + $0x50] sm:$0xff] }
 0x76a   :  { %v1571_v18 = vmul.f32 %v1972_v24, %v1565_v56  ;;  %v1529_v54 = vpop.xlane.xlu1 %1528  ;;  %vm1577_vm6 = vweird.f32 %v1972_v24 }
 0x76b   :  { %1973 = vrsqrt.f32 %v1566_v49  ;;  %v1547_v19 = vmul.f32 0.001953125, %v1529_v54  ;;  %v1552_v59 = vmul.f32 %v2905_v31, %v2905_v31  ;;  %vm1578_vm8 = vmor %vm1576_vm7, %vm1577_vm6  ;;  %vm1586_vm9 = vweird.f32 %v1566_v49 }
 0x76c   :  { %v1572_v60 = vmul.f32 %v1972_v24, %v1571_v18 }
 0x76d   :  { %v1557_v11 = vsub.f32 %v1547_v19, %v1552_v59 }
 0x76e   :  { %v1573_v37 = vmul.f32 0.5, %v1572_v60 }
 0x76f   :  { %v1562_v1 = vmax.f32 %v1557_v11, 0.0 }
 0x770   :  { %v1574_v9 = vsub.f32 1.5, %v1573_v37  ;;  %v1489_v38 = vpop.xlane.xlu0 %1488 }
 0x771   :  { %v1974_v39 = vpop.eup %1973  ;;  %v1567_v40 = vadd.f32 1e-05, %v1562_v1  ;;  %v2909_v52 = vmul.f32 0.001953125, %v1489_v38 }
 0x772   :  { %v1581_v25 = vmul.f32 %v1974_v39, %v1566_v49  ;;  %v1534_v22 = vpop.xlane.xlu2 %1533  ;;  %v1575_v13 = vmul.f32 %v1972_v24, %v1574_v9  ;;  %vm1587_vm0 = vweird.f32 %v1974_v39 }
 0x773   :  { %1975 = vrsqrt.f32 %v1567_v40  ;;  %v1548_v61 = vmul.f32 0.001953125, %v1534_v22  ;;  %v1553_v47 = vmul.f32 %v2909_v52, %v2909_v52  ;;  %vm1588_vm10 = vmor %vm1586_vm9, %vm1587_vm0  ;;  %vm1596_vm12 = vweird.f32 %v1567_v40 }
 0x774   :  { %v1582_v5 = vmul.f32 %v1974_v39, %v1581_v25  ;;  %v1579_v6 = vsel %vm1578_vm8, %v1972_v24, %v1575_v13  ;;  %v1622_v25 = vld [vmem:[%s3006_s7 + $0x58] sm:$0xff] }
 0x775   :  { %v1558_v0 = vsub.f32 %v1548_v61, %v1553_v47  ;;  %v1625_v42 = vmul.f32 %v1620_v44, %v1579_v6 }
 0x776   :  { %v1583_v36 = vmul.f32 0.5, %v1582_v5 }
 0x777   :  { %v1563_v45 = vmax.f32 %v1558_v0, 0.0  ;;  %1652 = vperm.xlu2 %1946, %v1625_v42  }
 0x778   :  { %v1584_v17 = vsub.f32 1.5, %v1583_v36  ;;  %v1494_v20 = vpop.xlane.xlu1 %1493 }
 0x779   :  { %v1976_v48 = vpop.eup %1975  ;;  %v1568_v56 = vadd.f32 1e-05, %v1563_v45  ;;  %v2916_v29 = vmul.f32 0.001953125, %v1494_v20 }
 0x77a   :  { %v1591_v50 = vmul.f32 %v1976_v48, %v1567_v40  ;;  %v1539_v55 = vpop.xlane.xlu0 %1538  ;;  %v1585_v30 = vmul.f32 %v1974_v39, %v1584_v17  ;;  %vm1597_vm11 = vweird.f32 %v1976_v48  ;;  %v1623_v40 = vld [vmem:[%s3006_s7 + $0x60] sm:$0xff] }
 0x77b   :  { %1977 = vrsqrt.f32 %v1568_v56  ;;  %v1549_v12 = vmul.f32 0.001953125, %v1539_v55  ;;  %v1554_v24 = vmul.f32 %v2916_v29, %v2916_v29  ;;  %vm1598_vm13 = vmor %vm1596_vm12, %vm1597_vm11  ;;  %vm1606_vm15 = vweird.f32 %v1568_v56 }
 0x77c   :  { %v1592_v18 = vmul.f32 %v1976_v48, %v1591_v50  ;;  %v1589_v54 = vsel %vm1588_vm10, %v1974_v39, %v1585_v30  ;;  %v1700_v55 = vstv %s1931_s27  ;;  %v1718_v30 = vstv %s1932_s28 }
 0x77d   :  { %v1559_v19 = vsub.f32 %v1549_v12, %v1554_v24  ;;  %v1626_v59 = vmul.f32 %v1621_v46, %v1589_v54  ;;  %v1630_v46 = vsub.f32 %v2797_v34, %v2897_v8  ;;  %v1631_v12 = vsub.f32 %v2799_v35, %v2897_v8  ;;  %v3036_v54 = vld [vmem:[#allocation11_spill] sm:$0xff]  ;;  %v3040_v35 = vld [vmem:[#allocation9_spill] sm:$0xff] }
 0x77e   :  { %v1593_v60 = vmul.f32 0.5, %v1592_v18  ;;  %v1632_v24 = vsub.f32 %v2807_v7, %v2897_v8  ;;  %v1633_v18 = vsub.f32 %v2809_v51, %v2897_v8  ;;  %v3043_v51 = vld [vmem:[#allocation13_spill] sm:$0xff] }
 0x77f   :  { %v1564_v11 = vmax.f32 %v1559_v19, 0.0  ;;  %1657 = vperm.xlu1 %1948, %v1626_v59   ;;  %v1701_v19 = vmul.f32 %v1700_v55, %v3036_v54  ;;  %v3037_v59 = vld [vmem:[#allocation14_spill] sm:$0xff]  ;;  %v1722_v8 = vmul.f32 %v1718_v30, %v3043_v51  ;;  %v1641_v51 = vsub.f32 %v2849_v15, %v2905_v31 }
 0x780   :  { %v1594_v49 = vsub.f32 1.5, %v1593_v60  ;;  %v1702_v60 = vmul.f32 %v1700_v55, %v3037_v59  ;;  %v1735_v59 = vld [vmem:[#allocation4 + $0x98] sm:$0xff]  ;;  %v1645_v15 = vsub.f32 %v2869_v63, %v2909_v52 }
 0x781   :  { %v1978_v37 = vpop.eup %1977  ;;  %v1569_v1 = vadd.f32 1e-05, %v1564_v11  ;;  %v3038_v11 = vld [vmem:[#allocation15_spill] sm:$0xff] }
 0x782   :  { %v1601_v9 = vmul.f32 %v1978_v37, %v1568_v56  ;;  %v1595_v38 = vmul.f32 %v1976_v48, %v1594_v49  ;;  %vm1607_vm14 = vweird.f32 %v1978_v37  ;;  %v1703_v49 = vmul.f32 %v1700_v55, %v3038_v11 }
 0x783   :  { %1979 = vrsqrt.f32 %v1569_v1  ;;  %vm1608_vm1 = vmor %vm1606_vm15, %vm1607_vm14  ;;  %vm1616_vm3 = vweird.f32 %v1569_v1 }
 0x784   :  { %v1602_v22 = vmul.f32 %v1978_v37, %v1601_v9  ;;  %v1599_v39 = vsel %vm1598_vm13, %v1976_v48, %v1595_v38  ;;  %v1624_v48 = vld [vmem:[%s3006_s7 + $0x68] sm:$0xff]  ;;  %s1933_s7 = sld [smem:[#allocation5 + $0xb]] }
 0x785   :  { %v1627_v13 = vmul.f32 %v1622_v25, %v1599_v39  ;;  %v1719_v39 = vmul.f32 %v1718_v30, %v3040_v35 }
 0x786   :  { %v1603_v44 = vmul.f32 0.5, %v1602_v22 }
 0x787   :  { %1662 = vperm.xlu0 %1947, %v1627_v13   ;;  %v3041_v13 = vld [vmem:[#allocation10_spill] sm:$0xff] }
 0x788   :  { %v1604_v61 = vsub.f32 1.5, %v1603_v44  ;;  %v1720_v7 = vmul.f32 %v1718_v30, %v3041_v13  ;;  %v3042_v44 = vld [vmem:[#allocation12_spill] sm:$0xff]  ;;  %v1772_v13 = vstv %s2948_s30 }
 0x789   :  { %v1980_v47 = vpop.eup %1979  ;;  %v1773_v63 = vmul.f32 %v1772_v13, %v2714_v57  ;;  %v1649_v57 = vsub.f32 %v2889_v58, %v2916_v29 }
 0x78a   :  { %v1611_v5 = vmul.f32 %v1980_v47, %v1569_v1  ;;  %v1605_v6 = vmul.f32 %v1978_v37, %v1604_v61  ;;  %vm1617_vm2 = vweird.f32 %v1980_v47  ;;  %v1721_v61 = vmul.f32 %v1718_v30, %v3042_v44  ;;  %v1732_v30 = vld [vmem:[#allocation4 + $0x88] sm:$0xff] }
 0x78b   :  { %vm1618_vm4 = vmor %vm1616_vm3, %vm1617_vm2  ;;  %v1639_v44 = vsub.f32 %v2839_v43, %v2905_v31  ;;  %v1643_v43 = vsub.f32 %v2859_v2, %v2909_v52  ;;  %v1774_v2 = vmul.f32 %v1772_v13, %v2716_v21  ;;  %v1647_v21 = vsub.f32 %v2879_v33, %v2916_v29 }
 0x78c   :  { %v1612_v0 = vmul.f32 %v1980_v47, %v1611_v5  ;;  %v1609_v42 = vsel %vm1608_vm1, %v1978_v37, %v1605_v6  ;;  %v3039_v37 = vld [vmem:[#allocation16_spill] sm:$0xff] }
 0x78d   :  { %v1628_v36 = vmul.f32 %v1623_v40, %v1609_v42  ;;  %v1704_v1 = vmul.f32 %v1700_v55, %v3039_v37  ;;  %v1751_v37 = vld [vmem:[#allocation4 + $0x50] sm:$0xff] }
 0x78e   :  { %v1613_v45 = vmul.f32 0.5, %v1612_v0 }
 0x78f   :  { %1667 = vperm.xlu2 %1946, %v1628_v36  }
 0x790   :  { %v1614_v17 = vsub.f32 1.5, %v1613_v45 }
 0x792   :  { %v1615_v20 = vmul.f32 %v1980_v47, %v1614_v17  ;;  %v1634_v17 = vsub.f32 %v2817_v41, %v2901_v53  ;;  %v1750_v41 = vld [vmem:[#allocation4 + $0x38] sm:$0xff] }
 0x794   :  { %v1619_v56 = vsel %vm1618_vm4, %v1980_v47, %v1615_v20  ;;  %v1635_v20 = vsub.f32 %v2819_v4, %v2901_v53 }
 0x795   :  { %v1629_v50 = vmul.f32 %v1624_v48, %v1619_v56  ;;  %v1636_v48 = vsub.f32 %v2827_v62, %v2901_v53  ;;  %v1637_v56 = vsub.f32 %v2829_v32, %v2901_v53  ;;  %v1753_v32 = vld [vmem:[#allocation4 + $0xa0] sm:$0xff] }
 0x797   :  { %1672 = vperm.xlu0 %1947, %v1629_v50   ;;  %v1736_v50 = vstv %s1933_s7 }
 0x798   :  { %v1737_v53 = vmul.f32 %v1736_v50, %v1732_v30 }
 0x7d1   :  { %v1653_v9 = vpop.permute.xlu2 %1652 }
 0x7d2   :  { %v1675_v38 = vmul.f32 %v1653_v9, %v1630_v46  ;;  %v1676_v34 = vmul.f32 %v1653_v9, %v1631_v12  ;;  %v1677_v25 = vmul.f32 %v1653_v9, %v1632_v24  ;;  %v1678_v22 = vmul.f32 %v1653_v9, %v1633_v18  ;;  %v1733_v46 = vld [vmem:[#allocation4 + $0x90] sm:$0xff] }
 0x7d3   :  { %v1738_v9 = vmul.f32 %v1736_v50, %v1733_v46 }
 0x7d4   :  { %v1709_v47 = vadd.f32 %v1701_v19, %v1675_v38  ;;  %v1710_v5 = vadd.f32 %v1702_v60, %v1676_v34  ;;  %v1711_v6 = vadd.f32 %v1703_v49, %v1677_v25  ;;  %v1712_v40 = vadd.f32 %v1704_v1, %v1678_v22  ;;  %v1734_v19 = vld [vmem:[#allocation4 + $0x18] sm:$0xff]  ;;  %v1752_v1 = vld [vmem:[#allocation4 + $0x70] sm:$0xff] }
 0x7d5   :  { %v1754_v60 = vstv %s1934_s29  ;;  %v1739_v38 = vmul.f32 %v1736_v50, %v1734_v19  ;;  %v1740_v34 = vmul.f32 %v1736_v50, %v1735_v59 }
 0x7d6   :  { %v1723_v0 = vadd.f32 %v1719_v39, %v1709_v47  ;;  %v1724_v42 = vadd.f32 %v1720_v7, %v1710_v5  ;;  %v1725_v36 = vadd.f32 %v1721_v61, %v1711_v6  ;;  %v1726_v45 = vadd.f32 %v1722_v8, %v1712_v40 }
 0x7d7   :  { %v1755_v25 = vmul.f32 %v1754_v60, %v1750_v41  ;;  %v1756_v22 = vmul.f32 %v1754_v60, %v1751_v37  ;;  %v1757_v35 = vmul.f32 %v1754_v60, %v1752_v1  ;;  %v1758_v39 = vmul.f32 %v1754_v60, %v1753_v32 }
 0x7d8   :  { %v1638_v7 = vsub.f32 %v2837_v16, %v2905_v31  ;;  %v1640_v61 = vsub.f32 %v2847_v14, %v2905_v31  ;;  %v1642_v16 = vsub.f32 %v2857_v27, %v2909_v52  ;;  %v1644_v14 = vsub.f32 %v2867_v3, %v2909_v52 }
 0x7d9   :  { %v1776_v3 = vmul.f32 %v1772_v13, %v2720_v28 }
 0x7f1   :  { %v1658_v55 = vpop.permute.xlu1 %1657 }
 0x7f2   :  { %v1679_v12 = vmul.f32 %v1658_v55, %v1634_v17  ;;  %v1680_v24 = vmul.f32 %v1658_v55, %v1635_v20  ;;  %v1681_v18 = vmul.f32 %v1658_v55, %v1636_v48  ;;  %v1682_v54 = vmul.f32 %v1658_v55, %v1637_v56 }
 0x7f4   :  { %v1727_v4 = vadd.f32 %v1723_v0, %v1679_v12  ;;  %v1728_v11 = vadd.f32 %v1724_v42, %v1680_v24  ;;  %v1729_v49 = vadd.f32 %v1725_v36, %v1681_v18  ;;  %v1730_v62 = vadd.f32 %v1726_v45, %v1682_v54  ;;  %v1668_v0 = vpop.permute.xlu2 %1667 }
 0x7f5   :  { %v1687_v50 = vmul.f32 %v1668_v0, %v1642_v16  ;;  %v1688_v55 = vmul.f32 %v1668_v0, %v1643_v43  ;;  %v1689_v30 = vmul.f32 %v1668_v0, %v1644_v14  ;;  %v1690_v46 = vmul.f32 %v1668_v0, %v1645_v15 }
 0x7f6   :  { %v1741_v8 = vadd.f32 %v1737_v53, %v1727_v4  ;;  %v1742_v47 = vadd.f32 %v1738_v9, %v1728_v11  ;;  %v1743_v5 = vadd.f32 %v1739_v38, %v1729_v49  ;;  %v1744_v6 = vadd.f32 %v1740_v34, %v1730_v62 }
 0x7f7   :  { %v1775_v54 = vmul.f32 %v1772_v13, %v2718_v26  ;;  %v1646_v62 = vsub.f32 %v2877_v10, %v2916_v29  ;;  %v1648_v26 = vsub.f32 %v2887_v23, %v2916_v29 }
 0x7f9   :  { %v1663_v40 = vpop.permute.xlu0 %1662 }
 0x7fa   :  { %v1683_v42 = vmul.f32 %v1663_v40, %v1638_v7  ;;  %v1684_v36 = vmul.f32 %v1663_v40, %v1639_v44  ;;  %v1685_v45 = vmul.f32 %v1663_v40, %v1640_v61  ;;  %v1686_v17 = vmul.f32 %v1663_v40, %v1641_v51 }
 0x7fc   :  { %v1745_v31 = vadd.f32 %v1741_v8, %v1683_v42  ;;  %v1746_v20 = vadd.f32 %v1742_v47, %v1684_v36  ;;  %v1747_v48 = vadd.f32 %v1743_v5, %v1685_v45  ;;  %v1748_v56 = vadd.f32 %v1744_v6, %v1686_v17 }
 0x7fe   :  { %v1759_v12 = vadd.f32 %v1755_v25, %v1745_v31  ;;  %v1760_v24 = vadd.f32 %v1756_v22, %v1746_v20  ;;  %v1761_v27 = vadd.f32 %v1757_v35, %v1747_v48  ;;  %v1762_v18 = vadd.f32 %v1758_v39, %v1748_v56 }
 0x800   :  { %v1763_v52 = vadd.f32 %v1759_v12, %v1687_v50  ;;  %v1764_v19 = vadd.f32 %v1760_v24, %v1688_v55  ;;  %v1765_v59 = vadd.f32 %v1761_v27, %v1689_v30  ;;  %v1766_v41 = vadd.f32 %v1762_v18, %v1690_v46 }
 0x802   :  { %v1777_v60 = vadd.f32 %v1773_v63, %v1763_v52  ;;  %v1778_v4 = vadd.f32 %v1774_v2, %v1764_v19  ;;  %v1779_v11 = vadd.f32 %v1775_v54, %v1765_v59  ;;  %v1780_v49 = vadd.f32 %v1776_v3, %v1766_v41 }
 0x809   :  { %v1673_v28 = vpop.permute.xlu0 %1672 }
 0x80a   :  { %v1691_v37 = vmul.f32 %v1673_v28, %v1646_v62  ;;  %v1692_v1 = vmul.f32 %v1673_v28, %v1647_v21  ;;  %v1693_v32 = vmul.f32 %v1673_v28, %v1648_v26  ;;  %v1694_v53 = vmul.f32 %v1673_v28, %v1649_v57 }
 0x80c   :  { %v1781_v9 = vadd.f32 %v1777_v60, %v1691_v37  ;;  %v1782_v38 = vadd.f32 %v1778_v4, %v1692_v1  ;;  %v1783_v34 = vadd.f32 %v1779_v11, %v1693_v32  ;;  %v1784_v25 = vadd.f32 %v1780_v49, %v1694_v53 }
 0x80e   :  { %1785 = vst [vmem:[#allocation4 + $0x80] sm:$0xff] %v1781_v9 }
 0x80f   :  { %1786 = vst [vmem:[#allocation4 + $0xb8] sm:$0xff] %v1782_v38 }
 0x810   :  { %1787 = vst [vmem:[#allocation4 + $0x20] sm:$0xff] %v1783_v34 }
 0x811   :  { %1788 = vst [vmem:[#allocation4 + $0x8] sm:$0xff] %v1784_v25 }
 0x815   :  { %v1807_v10 = vld [vmem:[#allocation4 + $0x80] sm:$0xf] }
 0x816   :  { %v1808_v33 = vld [vmem:[#allocation4 + $0xb8] sm:$0xf]  ;;  %v1811_v22 = vrot.slane %v1807_v10, 4 }
 0x817   :  { %v1812_v23 = vrot.slane %v1808_v33, 4  ;;  %v1836_v35 = vld [vmem:[#allocation4 + $0x20] sm:$0xf] }
 0x818   :  { %1815 = vst [vmem:[%s3008_s9 + $0x10] sm:$0xf0] %v1811_v22  ;;  %v1837_v58 = vld [vmem:[#allocation4 + $0x8] sm:$0xf]  ;;  %v1840_v29 = vrot.slane %v1836_v35, 4 }
 0x819   :  { %1816 = vst [vmem:[%s3008_s9 + $0x18] sm:$0xf0] %v1812_v23  ;;  %v1841_v39 = vrot.slane %v1837_v58, 4 }
 0x81a   :  { %1942 = vst [vmem:[%s3008_s9 + $0x30] sm:$0xf0] %v1840_v29 }
 0x81b   :  { %1943 = vst [vmem:[%s3008_s9 + $0x38] sm:$0xf0] %v1841_v39 }
 0x81c   :  { %1850 = vsyncpa [#allocation6], 1 }

</bundles_post_ra>
